<compile_context>
chip_gen: v5e
topology: v5e:2x2
jax: 0.10.0
libtpu: 0.0.40
codegen_flags: <defaults>
</compile_context>

<pallas_src>
import functools
import math

import jax
import jax.numpy as jnp
from jax.experimental import pallas as pl
from jax.experimental.pallas import tpu as pltpu


# ---------------------------------------------------------------------------
# Kernel
# ---------------------------------------------------------------------------
def _gau_kernel(hbf_ref, hq_ref, wu_ref, wv_ref, wz_ref, wo_ref, gqk_ref,
                out_ref, z_scr, zt_scr, v_scr,
                *, tq, pc, n_chunks, attn_scale, eps):
    """One (batch b, query tile qi) step of the fused GAU + Norm forward."""
    qi = pl.program_id(1)

    # ---- once per batch element: full-sequence z / v projections -----------
    # (qi axis must stay "arbitrary": later tiles reuse this scratch.)
    @pl.when(qi == 0)
    def _():
        def project(hb):
            xz = jnp.dot(hb, wz_ref[...], preferred_element_type=jnp.float32)
            z = xz * jax.nn.sigmoid(xz)                       # swish (f32)
            xv = jnp.dot(hb, wv_ref[...], preferred_element_type=jnp.float32)
            v = xv * jax.nn.sigmoid(xv)
            return z.astype(jnp.bfloat16), v.astype(jnp.bfloat16)

        if n_chunks == 1:
            z_b, v_b = project(hbf_ref[...])
            z_scr[...] = z_b
            v_scr[...] = v_b
        else:
            # Chunked so the f32 xz/xv temporaries stay ~pc*(S+E), not N*(S+E).
            def body(c, carry):
                cs = pl.multiple_of(c * pc, pc)
                z_b, v_b = project(hbf_ref[pl.ds(cs, pc), :])
                z_scr[pl.ds(cs, pc), :] = z_b
                v_scr[pl.ds(cs, pc), :] = v_b
                return carry
            jax.lax.fori_loop(0, n_chunks, body, 0)

        # Pre-transpose the (un-scaled) key side once per batch so every query
        # tile's logits matmul is a plain [tq,S]x[S,N] MXU op (no per-tile XLU
        # transpose of the full [N,S] key matrix).  Transpose via f32 (native
        # XLU path); once per batch, so the N*S f32 temp is cheap.
        zt_scr[...] = z_scr[...].astype(jnp.float32).T.astype(jnp.bfloat16)

    # ---- per query tile -----------------------------------------------------
    h_q = hq_ref[...]                                         # [tq, H] f32 residual
    hb_q = h_q.astype(jnp.bfloat16)

    xu = jnp.dot(hb_q, wu_ref[...], preferred_element_type=jnp.float32)
    u = xu * jax.nn.sigmoid(xu)                               # [tq, E] f32

    # q = z * (gamma_q * gamma_k * softmax_plus scale); k = z (un-scaled).
    qs = pl.multiple_of(qi * tq, tq)
    zq = z_scr[pl.ds(qs, tq), :].astype(jnp.float32)          # [tq, S_pad]
    q = (zq * (gqk_ref[...] * attn_scale)).astype(jnp.bfloat16)

    a = jnp.dot(q, zt_scr[...], preferred_element_type=jnp.float32)   # [tq, N]
    e = jnp.exp(a - jnp.max(a, axis=-1, keepdims=True))
    s = jnp.sum(e, axis=-1, keepdims=True)                    # [tq, 1]

    # Flash-style post-scale: normalize after the AV matmul (tq*E multiplies
    # instead of tq*N), with the EUP approx reciprocal (~1e-3 rel error).
    av = jnp.dot(e.astype(jnp.bfloat16), v_scr[...],
                 preferred_element_type=jnp.float32)          # [tq, E]
    av = av * pl.reciprocal(s, approx=True)

    g = (u * av).astype(jnp.bfloat16)
    o = jnp.dot(g, wo_ref[...], preferred_element_type=jnp.float32)   # [tq, H]

    # residual + RMS-style Norm in f32.
    y = h_q + o
    var = jnp.mean(y * y, axis=-1, keepdims=True)
    out_ref[...] = (y * jax.lax.rsqrt(var + eps)).astype(out_ref.dtype)


# ---------------------------------------------------------------------------
# Wrapper helpers
# ---------------------------------------------------------------------------
def _vmem_capacity_bytes():
    try:
        cap = getattr(pltpu.get_tpu_info(), "vmem_capacity_bytes", None)
        if cap:
            return int(cap)
    except Exception:
        pass
    return 128 * 1024 * 1024      # assume a 128 MiB-VMEM part if unknown


def _pick_q_tile(n, vmem_cap):
    # 64 MiB-VMEM parts (v7x-class): keep the [tq, N] f32 softmax temporaries
    # small.  128 MiB parts (v5e/v6e): bigger tiles amortize per-step overhead.
    candidates = (256, 128) if vmem_cap <= 80 * 1024 * 1024 else (512, 256, 128)
    for t in candidates:
        if n % t == 0:
            return t
    # TODO(synk): ragged N falls back to a single full-sequence tile; fine for
    # short sequences, may overflow VMEM for long non-128-multiple sequences.
    return n


def _pick_proj_chunk(n):
    for t in (512, 256, 128):
        if n % t == 0:
            return t
    return n


def prepare_gau_params(wi_t, wo_t, gq, gk, *, attention_key_size,
                       intermediate_size):
    """Split / bf16-cast / lane-pad the GAU weights once; cache across calls."""
    H = wi_t.shape[0]
    E = int(intermediate_size)
    S = int(attention_key_size)
    assert wi_t.shape == (H, 2 * E + S)
    assert wo_t.shape == (E, H)

    # Pad the attention key size to a lane-dense multiple of 128.  Numerically
    # exact: padded Wz columns are zero => padded z / q components are zero.
    S_pad = max(128, ((S + 127) // 128) * 128)

    wz_pad = jnp.zeros((H, S_pad), jnp.float32).at[:, :S].set(
        wi_t[:, 2 * E:].astype(jnp.float32))
    gqk = jnp.zeros((1, S_pad), jnp.float32).at[:, :S].set(
        (gq.astype(jnp.float32) * gk.astype(jnp.float32)).reshape(1, S))

    return dict(
        wu=wi_t[:, :E].astype(jnp.bfloat16),
        wv=wi_t[:, E:2 * E].astype(jnp.bfloat16),
        wz=wz_pad.astype(jnp.bfloat16),
        wo=wo_t.astype(jnp.bfloat16),
        gqk=gqk,
        hidden_size=H,
        intermediate_size=E,
        attention_key_size=S,
        attention_key_size_padded=S_pad,
    )


def _gau_pallas_call(h_bf16, h_f32, params, *, tq, pc, attn_scale, eps,
                     weight_mode):
    B, N, H = h_f32.shape
    E = params["intermediate_size"]
    S_pad = params["attention_key_size_padded"]
    nq = N // tq
    n_chunks = N // pc

    def const_spec(shape):
        if weight_mode is None:
            return pl.BlockSpec(shape, lambda b, qi: (0, 0))
        return pl.BlockSpec(shape, lambda b, qi: (0, 0),
                            pipeline_mode=weight_mode)

    kernel = functools.partial(_gau_kernel, tq=tq, pc=pc, n_chunks=n_chunks,
                               attn_scale=attn_scale, eps=eps)

    # Rough VMEM budget (bytes).
    est = (3 * H * E + H * S_pad) * 2 + S_pad * 4        # single-buffered weights + gamma
    est += 2 * N * H * 2                                 # full-seq bf16 hidden (double-buffered)
    est += 2 * 2 * tq * H * 4                            # per-tile f32 hidden + output blocks
    est += (2 * N * S_pad + N * E) * 2                   # persistent z / z^T / v scratch (bf16)
    est += (2 * tq * N + 2 * tq * E + 2 * tq * H) * 4    # per-tile f32 temporaries
    est += pc * (S_pad + E) * 4 + N * S_pad * 4          # projection-chunk + transpose temps
    cap = _vmem_capacity_bytes()
    headroom_cap = min(100 * 1024 * 1024, int(cap * 0.82))   # never the full physical VMEM
    vmem_limit = max(32 * 1024 * 1024, min(headroom_cap, int(est * 1.6)))

    return pl.pallas_call(
        kernel,
        out_shape=jax.ShapeDtypeStruct((B, N, H), h_f32.dtype),
        grid_spec=pltpu.PrefetchScalarGridSpec(
            num_scalar_prefetch=0,
            grid=(B, nq),
            in_specs=[
                pl.BlockSpec((None, N, H), lambda b, qi: (b, 0, 0)),    # hidden, full seq, bf16
                pl.BlockSpec((None, tq, H), lambda b, qi: (b, qi, 0)),  # hidden, q tile, f32
                const_spec((H, E)),        # Wu^T
                const_spec((H, E)),        # Wv^T
                const_spec((H, S_pad)),    # Wz^T (lane-padded)
                const_spec((E, H)),        # Wo^T
                const_spec((1, S_pad)),    # gamma_q * gamma_k (lane-padded)
            ],
            out_specs=pl.BlockSpec((None, tq, H), lambda b, qi: (b, qi, 0)),
            scratch_shapes=[
                pltpu.VMEM((N, S_pad), jnp.bfloat16),   # z (row-major, q side)
                pltpu.VMEM((S_pad, N), jnp.bfloat16),   # z^T (key side, pre-transposed)
                pltpu.VMEM((N, E), jnp.bfloat16),       # v
            ],
        ),
        compiler_params=pltpu.CompilerParams(
            # qi must stay "arbitrary": scratch written at qi==0 is reused by
            # every later query tile of the same batch element.
            dimension_semantics=("parallel", "arbitrary"),
            vmem_limit_bytes=vmem_limit),
    )(h_bf16, h_f32, params["wu"], params["wv"], params["wz"], params["wo"],
      params["gqk"])


def gau_layer(hidden_states, params, *, eps=1e-12):
    """GAULayer forward (eval mode): Norm(h + GAU(h))."""
    B, N, H = hidden_states.shape
    assert H == params["hidden_size"]
    S = params["attention_key_size"]

    cap = _vmem_capacity_bytes()
    tq = _pick_q_tile(N, cap)
    pc = _pick_proj_chunk(N)

    # softmax_plus scale (mask-free): 1/sqrt(S) * log(N)/log(512); applied to
    # the combined q-side gamma inside the kernel as a static constant.
    attn_scale = (1.0 / math.sqrt(S)) * (math.log(N) / math.log(512.0))

    h_bf16 = hidden_states.astype(jnp.bfloat16)

    try:
        return _gau_pallas_call(h_bf16, hidden_states, params, tq=tq, pc=pc,
                                attn_scale=attn_scale, eps=eps,
                                weight_mode=pl.Buffered(1))
    except Exception:
        # Fallback for JAX builds without BlockSpec(pipeline_mode=...) /
        # single-buffer support: default double-buffering of the weights.
        return _gau_pallas_call(h_bf16, hidden_states, params, tq=tq, pc=pc,
                                attn_scale=attn_scale, eps=eps,
                                weight_mode=None)


# ---------------------------------------------------------------------------
# References
# ---------------------------------------------------------------------------
def gau_layer_ref(h, wi_t, wo_t, gq, gk, *, attention_key_size,
                  intermediate_size, eps=1e-12):
    """Pure-f32 JAX reference mirroring the PyTorch forward (eval mode)."""
    E, S = intermediate_size, attention_key_size
    N = h.shape[1]
    x = h @ wi_t
    x = x * jax.nn.sigmoid(x)
    u, v, z = x[..., :E], x[..., E:2 * E], x[..., 2 * E:]
    q, k = z * gq, z * gk
    a = jnp.einsum('bmd,bnd->bmn', q, k) / math.sqrt(S)
    A = jax.nn.softmax(a * (math.log(N) / math.log(512.0)), axis=-1)
    o = (u * jnp.einsum('bmn,bnd->bmd', A, v)) @ wo_t
    y = h + o
    var = jnp.mean(y * y, axis=-1, keepdims=True)
    return y / jnp.sqrt(var + eps)


def gau_layer_ref_bf16(h, wi_t, wo_t, gq, gk, *, attention_key_size,
                       intermediate_size, eps=1e-12):
    """Reference mirroring the kernel's bf16-operand / f32-accumulate scheme."""
    E, S = intermediate_size, attention_key_size
    N = h.shape[1]
    f32 = jnp.float32
    attn_scale = (1.0 / math.sqrt(S)) * (math.log(N) / math.log(512.0))
    hb = h.astype(jnp.bfloat16)
    wu = wi_t[:, :E].astype(jnp.bfloat16)
    wv = wi_t[:, E:2 * E].astype(jnp.bfloat16)
    wz = wi_t[:, 2 * E:].astype(jnp.bfloat16)
    wo = wo_t.astype(jnp.bfloat16)
    xz = jnp.einsum('bnh,hs->bns', hb, wz, preferred_element_type=f32)
    zb = (xz * jax.nn.sigmoid(xz)).astype(jnp.bfloat16)            # z scratch (bf16)
    xv = jnp.einsum('bnh,he->bne', hb, wv, preferred_element_type=f32)
    vb = (xv * jax.nn.sigmoid(xv)).astype(jnp.bfloat16)
    xu = jnp.einsum('bnh,he->bne', hb, wu, preferred_element_type=f32)
    u = xu * jax.nn.sigmoid(xu)
    gqk = (gq * gk).astype(f32) * attn_scale
    q = (zb.astype(f32) * gqk).astype(jnp.bfloat16)
    a = jnp.einsum('bmd,bnd->bmn', q, zb, preferred_element_type=f32)
    e = jnp.exp(a - jnp.max(a, axis=-1, keepdims=True))
    s = jnp.sum(e, axis=-1, keepdims=True)
    av = jnp.einsum('bmn,bnd->bmd', e.astype(jnp.bfloat16), vb,
                    preferred_element_type=f32) / s
    g = (u * av).astype(jnp.bfloat16)
    o = jnp.einsum('bme,eh->bmh', g, wo, preferred_element_type=f32)
    y = h + o
    var = jnp.mean(y * y, axis=-1, keepdims=True)
    return y / jnp.sqrt(var + eps)


# ---------------------------------------------------------------------------
# Smoke test
# ---------------------------------------------------------------------------
if __name__ == "__main__":
    # Small synthetic config consistent with the module's shape relations.
    B, N, H = 2, 16, 32          # batch, seq, hidden_size
    E, S = 64, 32                # intermediate_size, attention_key_size

    key = jax.random.PRNGKey(0)
    k_h, k_wi, k_wo = jax.random.split(key, 3)

    hidden_states = jax.random.normal(k_h, (B, N, H), dtype=jnp.float32)
    wi_t = jax.random.normal(k_wi, (H, 2 * E + S), dtype=jnp.float32) * 0.05
    wo_t = jax.random.normal(k_wo, (E, H), dtype=jnp.float32) * 0.05
    gq = jnp.ones((S,), dtype=jnp.float32)   # ScaleOffset gammas init to ones
    gk = jnp.ones((S,), dtype=jnp.float32)

    # Weight prep is done once and reused across calls.
    params = prepare_gau_params(wi_t, wo_t, gq, gk,
                                attention_key_size=S, intermediate_size=E)

    out = gau_layer(hidden_states, params)
    out = jax.block_until_ready(out)

    ref_mixed = gau_layer_ref_bf16(hidden_states, wi_t, wo_t, gq, gk,
                                   attention_key_size=S, intermediate_size=E)
    assert jnp.allclose(out, ref_mixed, atol=5e-3, rtol=5e-3), (
        f"mismatch vs bf16-mirrored reference: "
        f"max abs diff {jnp.max(jnp.abs(out - ref_mixed))}")

    ref_f32 = gau_layer_ref(hidden_states, wi_t, wo_t, gq, gk,
                            attention_key_size=S, intermediate_size=E)
    assert jnp.allclose(out, ref_f32, atol=2e-2, rtol=2e-2), (
        f"mismatch vs f32 reference: "
        f"max abs diff {jnp.max(jnp.abs(out - ref_f32))}")

    print("KERNEL_OK")
</pallas_src>

<mosaic_0001>
module attributes {stable_mosaic.version = 11 : i64} {
  func.func @_gau_kernel(%arg0: i32, %arg1: i32, %arg2: memref<1x16x32xbf16, #tpu.memory_space<vmem>>, %arg3: memref<1x16x32xf32, #tpu.memory_space<vmem>>, %arg4: memref<32x64xbf16, #tpu.memory_space<vmem>>, %arg5: memref<32x64xbf16, #tpu.memory_space<vmem>>, %arg6: memref<32x128xbf16, #tpu.memory_space<vmem>>, %arg7: memref<64x32xbf16, #tpu.memory_space<vmem>>, %arg8: memref<1x128xf32, #tpu.memory_space<vmem>>, %arg9: memref<1x16x32xf32, #tpu.memory_space<vmem>>, %arg10: memref<16x128xbf16, #tpu.memory_space<vmem>>, %arg11: memref<128x16xbf16, #tpu.memory_space<vmem>>, %arg12: memref<16x64xbf16, #tpu.memory_space<vmem>>) attributes {dimension_semantics = [#tpu.dimension_semantics<parallel>, #tpu.dimension_semantics<arbitrary>], iteration_bounds = array<i64: 2, 1>, scalar_prefetch = 0 : i64, scratch_operands = 3 : i64, tpu.core_type = #tpu.core_type<tc>, window_params = [{transform_indices = @transform_0, window_bounds = array<i64: 1, 16, 32>}, {transform_indices = @transform_1, window_bounds = array<i64: 1, 16, 32>}, {pipeline_mode = #tpu.pipeline_mode<synchronous>, transform_indices = @transform_2, window_bounds = array<i64: 32, 64>}, {pipeline_mode = #tpu.pipeline_mode<synchronous>, transform_indices = @transform_3, window_bounds = array<i64: 32, 64>}, {pipeline_mode = #tpu.pipeline_mode<synchronous>, transform_indices = @transform_4, window_bounds = array<i64: 32, 128>}, {pipeline_mode = #tpu.pipeline_mode<synchronous>, transform_indices = @transform_5, window_bounds = array<i64: 64, 32>}, {pipeline_mode = #tpu.pipeline_mode<synchronous>, transform_indices = @transform_6, window_bounds = array<i64: 1, 128>}, {transform_indices = @transform_7, window_bounds = array<i64: 1, 16, 32>}]} {
    %c0_i32 = arith.constant 0 : i32
    %0 = arith.cmpi eq, %arg1, %c0_i32 : i32
    %1 = arith.extui %0 : i1 to i32
    %c0_i32_0 = arith.constant 0 : i32
    %2 = arith.cmpi ne, %1, %c0_i32_0 : i32
    scf.if %2 {
      %c0_27 = arith.constant 0 : index
      %c0_28 = arith.constant 0 : index
      %c0_29 = arith.constant 0 : index
      %58 = vector.load %arg2[%c0_27, %c0_28, %c0_29] : memref<1x16x32xbf16, #tpu.memory_space<vmem>>, vector<1x16x32xbf16>
      %59 = vector.shape_cast %58 : vector<1x16x32xbf16> to vector<16x32xbf16>
      %c0_30 = arith.constant 0 : index
      %c0_31 = arith.constant 0 : index
      %60 = vector.load %arg6[%c0_30, %c0_31] : memref<32x128xbf16, #tpu.memory_space<vmem>>, vector<32x128xbf16>
      %cst_32 = arith.constant dense<0.000000e+00> : vector<16x128xf32>
      %61 = tpu.matmul %59, %60, %cst_32 {dimension_numbers = #tpu.dot_dimension_numbers<[1], [0], [0], [1], [0, 0, 1, 1], [], []>} : vector<16x32xbf16>, vector<32x128xbf16>, vector<16x128xf32> -> vector<16x128xf32>
      %62 = arith.negf %61 : vector<16x128xf32>
      %63 = math.exp %62 : vector<16x128xf32>
      %cst_33 = arith.constant 1.000000e+00 : f32
      %64 = vector.broadcast %cst_33 : f32 to vector<16x128xf32>
      %65 = arith.addf %64, %63 : vector<16x128xf32>
      %66 = arith.divf %64, %65 : vector<16x128xf32>
      %67 = arith.mulf %61, %66 : vector<16x128xf32>
      %c0_34 = arith.constant 0 : index
      %c0_35 = arith.constant 0 : index
      %68 = vector.load %arg5[%c0_34, %c0_35] : memref<32x64xbf16, #tpu.memory_space<vmem>>, vector<32x64xbf16>
      %cst_36 = arith.constant dense<0.000000e+00> : vector<16x64xf32>
      %69 = tpu.matmul %59, %68, %cst_36 {dimension_numbers = #tpu.dot_dimension_numbers<[1], [0], [0], [1], [0, 0, 1, 1], [], []>} : vector<16x32xbf16>, vector<32x64xbf16>, vector<16x64xf32> -> vector<16x64xf32>
      %70 = arith.negf %69 : vector<16x64xf32>
      %71 = math.exp %70 : vector<16x64xf32>
      %cst_37 = arith.constant 1.000000e+00 : f32
      %72 = vector.broadcast %cst_37 : f32 to vector<16x64xf32>
      %73 = arith.addf %72, %71 : vector<16x64xf32>
      %74 = arith.divf %72, %73 : vector<16x64xf32>
      %75 = arith.mulf %69, %74 : vector<16x64xf32>
      %76 = arith.truncf %67 : vector<16x128xf32> to vector<16x128xbf16>
      %77 = arith.truncf %75 : vector<16x64xf32> to vector<16x64xbf16>
      %c0_38 = arith.constant 0 : index
      %c0_39 = arith.constant 0 : index
      %78 = vector.load %arg10[%c0_38, %c0_39] : memref<16x128xbf16, #tpu.memory_space<vmem>>, vector<16x128xbf16>
      tpu.vector_store %arg10[%c0_38, %c0_39], %76 {strides = array<i32>} : memref<16x128xbf16, #tpu.memory_space<vmem>>, vector<16x128xbf16>,
      %c0_40 = arith.constant 0 : index
      %c0_41 = arith.constant 0 : index
      %79 = vector.load %arg12[%c0_40, %c0_41] : memref<16x64xbf16, #tpu.memory_space<vmem>>, vector<16x64xbf16>
      tpu.vector_store %arg12[%c0_40, %c0_41], %77 {strides = array<i32>} : memref<16x64xbf16, #tpu.memory_space<vmem>>, vector<16x64xbf16>,
      %c0_42 = arith.constant 0 : index
      %c0_43 = arith.constant 0 : index
      %80 = vector.load %arg10[%c0_42, %c0_43] : memref<16x128xbf16, #tpu.memory_space<vmem>>, vector<16x128xbf16>
      %81 = arith.extf %80 : vector<16x128xbf16> to vector<16x128xf32>
      %82 = tpu.transpose %81, [1, 0] : vector<16x128xf32> -> vector<128x16xf32>
      %83 = arith.truncf %82 : vector<128x16xf32> to vector<128x16xbf16>
      %c0_44 = arith.constant 0 : index
      %c0_45 = arith.constant 0 : index
      %84 = vector.load %arg11[%c0_44, %c0_45] : memref<128x16xbf16, #tpu.memory_space<vmem>>, vector<128x16xbf16>
      tpu.vector_store %arg11[%c0_44, %c0_45], %83 {strides = array<i32>} : memref<128x16xbf16, #tpu.memory_space<vmem>>, vector<128x16xbf16>,
    } else {
    }
    %c0 = arith.constant 0 : index
    %c0_1 = arith.constant 0 : index
    %c0_2 = arith.constant 0 : index
    %3 = vector.load %arg3[%c0, %c0_1, %c0_2] : memref<1x16x32xf32, #tpu.memory_space<vmem>>, vector<1x16x32xf32>
    %4 = vector.shape_cast %3 : vector<1x16x32xf32> to vector<16x32xf32>
    %5 = arith.truncf %4 : vector<16x32xf32> to vector<16x32xbf16>
    %c0_3 = arith.constant 0 : index
    %c0_4 = arith.constant 0 : index
    %6 = vector.load %arg4[%c0_3, %c0_4] : memref<32x64xbf16, #tpu.memory_space<vmem>>, vector<32x64xbf16>
    %cst = arith.constant dense<0.000000e+00> : vector<16x64xf32>
    %7 = tpu.matmul %5, %6, %cst {dimension_numbers = #tpu.dot_dimension_numbers<[1], [0], [0], [1], [0, 0, 1, 1], [], []>} : vector<16x32xbf16>, vector<32x64xbf16>, vector<16x64xf32> -> vector<16x64xf32>
    %8 = arith.negf %7 : vector<16x64xf32>
    %9 = math.exp %8 : vector<16x64xf32>
    %cst_5 = arith.constant 1.000000e+00 : f32
    %10 = vector.broadcast %cst_5 : f32 to vector<16x64xf32>
    %11 = arith.addf %10, %9 : vector<16x64xf32>
    %12 = arith.divf %10, %11 : vector<16x64xf32>
    %13 = arith.mulf %7, %12 : vector<16x64xf32>
    %c16_i32 = arith.constant 16 : i32
    %14 = arith.muli %arg1, %c16_i32 : i32
    %15 = tpu.assume_multiple %14, 16 : i32
    %16 = arith.index_cast %15 : i32 to index
    %c0_6 = arith.constant 0 : index
    %17 = vector.load %arg10[%16, %c0_6] : memref<16x128xbf16, #tpu.memory_space<vmem>>, vector<16x128xbf16>
    %18 = arith.extf %17 : vector<16x128xbf16> to vector<16x128xf32>
    %c0_7 = arith.constant 0 : index
    %c0_8 = arith.constant 0 : index
    %19 = vector.load %arg8[%c0_7, %c0_8] : memref<1x128xf32, #tpu.memory_space<vmem>>, vector<1x128xf32>
    %cst_9 = arith.constant 0.0785674229 : f32
    %20 = vector.broadcast %cst_9 : f32 to vector<1x128xf32>
    %21 = arith.mulf %19, %20 : vector<1x128xf32>
    %22 = vector.broadcast %21 : vector<1x128xf32> to vector<16x128xf32>
    %23 = arith.mulf %18, %22 : vector<16x128xf32>
    %24 = arith.truncf %23 : vector<16x128xf32> to vector<16x128xbf16>
    %c0_10 = arith.constant 0 : index
    %c0_11 = arith.constant 0 : index
    %25 = vector.load %arg11[%c0_10, %c0_11] : memref<128x16xbf16, #tpu.memory_space<vmem>>, vector<128x16xbf16>
    %cst_12 = arith.constant dense<0.000000e+00> : vector<16x16xf32>
    %26 = tpu.matmul %24, %25, %cst_12 {dimension_numbers = #tpu.dot_dimension_numbers<[1], [0], [0], [1], [0, 0, 1, 1], [], []>} : vector<16x128xbf16>, vector<128x16xbf16>, vector<16x16xf32> -> vector<16x16xf32>
    %cst_13 = arith.constant dense<0xFF800000> : vector<16xf32>
    %27 = vector.multi_reduction <maximumf>, %26, %cst_13 [1] : vector<16x16xf32> to vector<16xf32>
    %28 = vector.shape_cast %27 : vector<16xf32> to vector<16x1xf32>
    %29 = vector.broadcast %28 : vector<16x1xf32> to vector<16x16xf32>
    %30 = arith.subf %26, %29 : vector<16x16xf32>
    %31 = math.exp %30 : vector<16x16xf32>
    %cst_14 = arith.constant dense<0.000000e+00> : vector<16xf32>
    %32 = vector.multi_reduction <add>, %31, %cst_14 [1] : vector<16x16xf32> to vector<16xf32>
    %33 = vector.shape_cast %32 : vector<16xf32> to vector<16x1xf32>
    %34 = arith.truncf %31 : vector<16x16xf32> to vector<16x16xbf16>
    %c0_15 = arith.constant 0 : index
    %c0_16 = arith.constant 0 : index
    %35 = vector.load %arg12[%c0_15, %c0_16] : memref<16x64xbf16, #tpu.memory_space<vmem>>, vector<16x64xbf16>
    %cst_17 = arith.constant dense<0.000000e+00> : vector<16x64xf32>
    %36 = tpu.matmul %34, %35, %cst_17 {dimension_numbers = #tpu.dot_dimension_numbers<[1], [0], [0], [1], [0, 0, 1, 1], [], []>} : vector<16x16xbf16>, vector<16x64xbf16>, vector<16x64xf32> -> vector<16x64xf32>
    %37 = tpu.reciprocal %33 {approx = true} : vector<16x1xf32> -> vector<16x1xf32>
    %38 = vector.broadcast %37 : vector<16x1xf32> to vector<16x64xf32>
    %39 = arith.mulf %36, %38 : vector<16x64xf32>
    %40 = arith.mulf %13, %39 : vector<16x64xf32>
    %41 = arith.truncf %40 : vector<16x64xf32> to vector<16x64xbf16>
    %c0_18 = arith.constant 0 : index
    %c0_19 = arith.constant 0 : index
    %42 = vector.load %arg7[%c0_18, %c0_19] : memref<64x32xbf16, #tpu.memory_space<vmem>>, vector<64x32xbf16>
    %cst_20 = arith.constant dense<0.000000e+00> : vector<16x32xf32>
    %43 = tpu.matmul %41, %42, %cst_20 {dimension_numbers = #tpu.dot_dimension_numbers<[1], [0], [0], [1], [0, 0, 1, 1], [], []>} : vector<16x64xbf16>, vector<64x32xbf16>, vector<16x32xf32> -> vector<16x32xf32>
    %44 = arith.addf %4, %43 : vector<16x32xf32>
    %45 = arith.mulf %44, %44 : vector<16x32xf32>
    %cst_21 = arith.constant dense<0.000000e+00> : vector<16xf32>
    %46 = vector.multi_reduction <add>, %45, %cst_21 [1] : vector<16x32xf32> to vector<16xf32>
    %47 = vector.shape_cast %46 : vector<16xf32> to vector<16x1xf32>
    %cst_22 = arith.constant 3.200000e+01 : f32
    %48 = vector.broadcast %cst_22 : f32 to vector<16x1xf32>
    %49 = arith.divf %47, %48 : vector<16x1xf32>
    %cst_23 = arith.constant 9.99999996E-13 : f32
    %50 = vector.broadcast %cst_23 : f32 to vector<16x1xf32>
    %51 = arith.addf %49, %50 : vector<16x1xf32>
    %52 = math.rsqrt %51 : vector<16x1xf32>
    %53 = vector.broadcast %52 : vector<16x1xf32> to vector<16x32xf32>
    %54 = arith.mulf %44, %53 : vector<16x32xf32>
    %c0_24 = arith.constant 0 : index
    %c0_25 = arith.constant 0 : index
    %c0_26 = arith.constant 0 : index
    %55 = vector.load %arg9[%c0_24, %c0_25, %c0_26] : memref<1x16x32xf32, #tpu.memory_space<vmem>>, vector<1x16x32xf32>
    %56 = vector.shape_cast %55 : vector<1x16x32xf32> to vector<16x32xf32>
    %57 = vector.shape_cast %54 : vector<16x32xf32> to vector<1x16x32xf32>
    tpu.vector_store %arg9[%c0_24, %c0_25, %c0_26], %57 {strides = array<i32>} : memref<1x16x32xf32, #tpu.memory_space<vmem>>, vector<1x16x32xf32>,
    return
  }
  func.func @transform_0(%arg0: i32, %arg1: i32) -> (i32, i32, i32) {
    %c0_i32 = arith.constant 0 : i32
    %c0_i32_0 = arith.constant 0 : i32
    %c0_i32_1 = arith.constant 0 : i32
    return %arg0, %c0_i32, %c0_i32_0 : i32, i32, i32
  }
  func.func @transform_1(%arg0: i32, %arg1: i32) -> (i32, i32, i32) {
    %c0_i32 = arith.constant 0 : i32
    %c0_i32_0 = arith.constant 0 : i32
    return %arg0, %arg1, %c0_i32 : i32, i32, i32
  }
  func.func @transform_2(%arg0: i32, %arg1: i32) -> (i32, i32) {
    %c0_i32 = arith.constant 0 : i32
    %c0_i32_0 = arith.constant 0 : i32
    %c0_i32_1 = arith.constant 0 : i32
    return %c0_i32, %c0_i32_0 : i32, i32
  }
  func.func @transform_3(%arg0: i32, %arg1: i32) -> (i32, i32) {
    %c0_i32 = arith.constant 0 : i32
    %c0_i32_0 = arith.constant 0 : i32
    %c0_i32_1 = arith.constant 0 : i32
    return %c0_i32, %c0_i32_0 : i32, i32
  }
  func.func @transform_4(%arg0: i32, %arg1: i32) -> (i32, i32) {
    %c0_i32 = arith.constant 0 : i32
    %c0_i32_0 = arith.constant 0 : i32
    %c0_i32_1 = arith.constant 0 : i32
    return %c0_i32, %c0_i32_0 : i32, i32
  }
  func.func @transform_5(%arg0: i32, %arg1: i32) -> (i32, i32) {
    %c0_i32 = arith.constant 0 : i32
    %c0_i32_0 = arith.constant 0 : i32
    %c0_i32_1 = arith.constant 0 : i32
    return %c0_i32, %c0_i32_0 : i32, i32
  }
  func.func @transform_6(%arg0: i32, %arg1: i32) -> (i32, i32) {
    %c0_i32 = arith.constant 0 : i32
    %c0_i32_0 = arith.constant 0 : i32
    %c0_i32_1 = arith.constant 0 : i32
    return %c0_i32, %c0_i32_0 : i32, i32
  }
  func.func @transform_7(%arg0: i32, %arg1: i32) -> (i32, i32, i32) {
    %c0_i32 = arith.constant 0 : i32
    %c0_i32_0 = arith.constant 0 : i32
    return %arg0, %arg1, %c0_i32 : i32, i32, i32
  }
}

module attributes {stable_mosaic.version = 11 : i64} {
  func.func @_gau_kernel(%arg0: i32, %arg1: i32, %arg2: memref<1x16x32xbf16, #tpu.memory_space<vmem>>, %arg3: memref<1x16x32xf32, #tpu.memory_space<vmem>>, %arg4: memref<32x64xbf16, #tpu.memory_space<vmem>>, %arg5: memref<32x64xbf16, #tpu.memory_space<vmem>>, %arg6: memref<32x128xbf16, #tpu.memory_space<vmem>>, %arg7: memref<64x32xbf16, #tpu.memory_space<vmem>>, %arg8: memref<1x128xf32, #tpu.memory_space<vmem>>, %arg9: memref<1x16x32xf32, #tpu.memory_space<vmem>>, %arg10: memref<16x128xbf16, #tpu.memory_space<vmem>>, %arg11: memref<128x16xbf16, #tpu.memory_space<vmem>>, %arg12: memref<16x64xbf16, #tpu.memory_space<vmem>>) attributes {dimension_semantics = [#tpu.dimension_semantics<parallel>, #tpu.dimension_semantics<arbitrary>], iteration_bounds = array<i64: 2, 1>, scalar_prefetch = 0 : i64, scratch_operands = 3 : i64, tpu.core_type = #tpu.core_type<tc>, window_params = [{transform_indices = @transform_0, window_bounds = array<i64: 1, 16, 32>}, {transform_indices = @transform_1, window_bounds = array<i64: 1, 16, 32>}, {pipeline_mode = #tpu.pipeline_mode<synchronous>, transform_indices = @transform_2, window_bounds = array<i64: 32, 64>}, {pipeline_mode = #tpu.pipeline_mode<synchronous>, transform_indices = @transform_3, window_bounds = array<i64: 32, 64>}, {pipeline_mode = #tpu.pipeline_mode<synchronous>, transform_indices = @transform_4, window_bounds = array<i64: 32, 128>}, {pipeline_mode = #tpu.pipeline_mode<synchronous>, transform_indices = @transform_5, window_bounds = array<i64: 64, 32>}, {pipeline_mode = #tpu.pipeline_mode<synchronous>, transform_indices = @transform_6, window_bounds = array<i64: 1, 128>}, {transform_indices = @transform_7, window_bounds = array<i64: 1, 16, 32>}]} {
    %c0_i32 = arith.constant 0 : i32
    %0 = arith.cmpi eq, %arg1, %c0_i32 : i32
    %1 = arith.extui %0 : i1 to i32
    %c0_i32_0 = arith.constant 0 : i32
    %2 = arith.cmpi ne, %1, %c0_i32_0 : i32
    scf.if %2 {
      %c0_27 = arith.constant 0 : index
      %c0_28 = arith.constant 0 : index
      %c0_29 = arith.constant 0 : index
      %58 = vector.load %arg2[%c0_27, %c0_28, %c0_29] : memref<1x16x32xbf16, #tpu.memory_space<vmem>>, vector<1x16x32xbf16>
      %59 = vector.shape_cast %58 : vector<1x16x32xbf16> to vector<16x32xbf16>
      %c0_30 = arith.constant 0 : index
      %c0_31 = arith.constant 0 : index
      %60 = vector.load %arg6[%c0_30, %c0_31] : memref<32x128xbf16, #tpu.memory_space<vmem>>, vector<32x128xbf16>
      %cst_32 = arith.constant dense<0.000000e+00> : vector<16x128xf32>
      %61 = tpu.matmul %59, %60, %cst_32 {dimension_numbers = #tpu.dot_dimension_numbers<[1], [0], [0], [1], [0, 0, 1, 1], [], []>} : vector<16x32xbf16>, vector<32x128xbf16>, vector<16x128xf32> -> vector<16x128xf32>
      %62 = arith.negf %61 : vector<16x128xf32>
      %63 = math.exp %62 : vector<16x128xf32>
      %cst_33 = arith.constant 1.000000e+00 : f32
      %64 = vector.broadcast %cst_33 : f32 to vector<16x128xf32>
      %65 = arith.addf %64, %63 : vector<16x128xf32>
      %66 = arith.divf %64, %65 : vector<16x128xf32>
      %67 = arith.mulf %61, %66 : vector<16x128xf32>
      %c0_34 = arith.constant 0 : index
      %c0_35 = arith.constant 0 : index
      %68 = vector.load %arg5[%c0_34, %c0_35] : memref<32x64xbf16, #tpu.memory_space<vmem>>, vector<32x64xbf16>
      %cst_36 = arith.constant dense<0.000000e+00> : vector<16x64xf32>
      %69 = tpu.matmul %59, %68, %cst_36 {dimension_numbers = #tpu.dot_dimension_numbers<[1], [0], [0], [1], [0, 0, 1, 1], [], []>} : vector<16x32xbf16>, vector<32x64xbf16>, vector<16x64xf32> -> vector<16x64xf32>
      %70 = arith.negf %69 : vector<16x64xf32>
      %71 = math.exp %70 : vector<16x64xf32>
      %cst_37 = arith.constant 1.000000e+00 : f32
      %72 = vector.broadcast %cst_37 : f32 to vector<16x64xf32>
      %73 = arith.addf %72, %71 : vector<16x64xf32>
      %74 = arith.divf %72, %73 : vector<16x64xf32>
      %75 = arith.mulf %69, %74 : vector<16x64xf32>
      %76 = arith.truncf %67 : vector<16x128xf32> to vector<16x128xbf16>
      %77 = arith.truncf %75 : vector<16x64xf32> to vector<16x64xbf16>
      %c0_38 = arith.constant 0 : index
      %c0_39 = arith.constant 0 : index
      %78 = vector.load %arg10[%c0_38, %c0_39] : memref<16x128xbf16, #tpu.memory_space<vmem>>, vector<16x128xbf16>
      tpu.vector_store %arg10[%c0_38, %c0_39], %76 {strides = array<i32>} : memref<16x128xbf16, #tpu.memory_space<vmem>>, vector<16x128xbf16>,
      %c0_40 = arith.constant 0 : index
      %c0_41 = arith.constant 0 : index
      %79 = vector.load %arg12[%c0_40, %c0_41] : memref<16x64xbf16, #tpu.memory_space<vmem>>, vector<16x64xbf16>
      tpu.vector_store %arg12[%c0_40, %c0_41], %77 {strides = array<i32>} : memref<16x64xbf16, #tpu.memory_space<vmem>>, vector<16x64xbf16>,
      %c0_42 = arith.constant 0 : index
      %c0_43 = arith.constant 0 : index
      %80 = vector.load %arg10[%c0_42, %c0_43] : memref<16x128xbf16, #tpu.memory_space<vmem>>, vector<16x128xbf16>
      %81 = arith.extf %80 : vector<16x128xbf16> to vector<16x128xf32>
      %82 = tpu.transpose %81, [1, 0] : vector<16x128xf32> -> vector<128x16xf32>
      %83 = arith.truncf %82 : vector<128x16xf32> to vector<128x16xbf16>
      %c0_44 = arith.constant 0 : index
      %c0_45 = arith.constant 0 : index
      %84 = vector.load %arg11[%c0_44, %c0_45] : memref<128x16xbf16, #tpu.memory_space<vmem>>, vector<128x16xbf16>
      tpu.vector_store %arg11[%c0_44, %c0_45], %83 {strides = array<i32>} : memref<128x16xbf16, #tpu.memory_space<vmem>>, vector<128x16xbf16>,
    } else {
    }
    %c0 = arith.constant 0 : index
    %c0_1 = arith.constant 0 : index
    %c0_2 = arith.constant 0 : index
    %3 = vector.load %arg3[%c0, %c0_1, %c0_2] : memref<1x16x32xf32, #tpu.memory_space<vmem>>, vector<1x16x32xf32>
    %4 = vector.shape_cast %3 : vector<1x16x32xf32> to vector<16x32xf32>
    %5 = arith.truncf %4 : vector<16x32xf32> to vector<16x32xbf16>
    %c0_3 = arith.constant 0 : index
    %c0_4 = arith.constant 0 : index
    %6 = vector.load %arg4[%c0_3, %c0_4] : memref<32x64xbf16, #tpu.memory_space<vmem>>, vector<32x64xbf16>
    %cst = arith.constant dense<0.000000e+00> : vector<16x64xf32>
    %7 = tpu.matmul %5, %6, %cst {dimension_numbers = #tpu.dot_dimension_numbers<[1], [0], [0], [1], [0, 0, 1, 1], [], []>} : vector<16x32xbf16>, vector<32x64xbf16>, vector<16x64xf32> -> vector<16x64xf32>
    %8 = arith.negf %7 : vector<16x64xf32>
    %9 = math.exp %8 : vector<16x64xf32>
    %cst_5 = arith.constant 1.000000e+00 : f32
    %10 = vector.broadcast %cst_5 : f32 to vector<16x64xf32>
    %11 = arith.addf %10, %9 : vector<16x64xf32>
    %12 = arith.divf %10, %11 : vector<16x64xf32>
    %13 = arith.mulf %7, %12 : vector<16x64xf32>
    %c16_i32 = arith.constant 16 : i32
    %14 = arith.muli %arg1, %c16_i32 : i32
    %15 = tpu.assume_multiple %14, 16 : i32
    %16 = arith.index_cast %15 : i32 to index
    %c0_6 = arith.constant 0 : index
    %17 = vector.load %arg10[%16, %c0_6] : memref<16x128xbf16, #tpu.memory_space<vmem>>, vector<16x128xbf16>
    %18 = arith.extf %17 : vector<16x128xbf16> to vector<16x128xf32>
    %c0_7 = arith.constant 0 : index
    %c0_8 = arith.constant 0 : index
    %19 = vector.load %arg8[%c0_7, %c0_8] : memref<1x128xf32, #tpu.memory_space<vmem>>, vector<1x128xf32>
    %cst_9 = arith.constant 0.0785674229 : f32
    %20 = vector.broadcast %cst_9 : f32 to vector<1x128xf32>
    %21 = arith.mulf %19, %20 : vector<1x128xf32>
    %22 = vector.broadcast %21 : vector<1x128xf32> to vector<16x128xf32>
    %23 = arith.mulf %18, %22 : vector<16x128xf32>
    %24 = arith.truncf %23 : vector<16x128xf32> to vector<16x128xbf16>
    %c0_10 = arith.constant 0 : index
    %c0_11 = arith.constant 0 : index
    %25 = vector.load %arg11[%c0_10, %c0_11] : memref<128x16xbf16, #tpu.memory_space<vmem>>, vector<128x16xbf16>
    %cst_12 = arith.constant dense<0.000000e+00> : vector<16x16xf32>
    %26 = tpu.matmul %24, %25, %cst_12 {dimension_numbers = #tpu.dot_dimension_numbers<[1], [0], [0], [1], [0, 0, 1, 1], [], []>} : vector<16x128xbf16>, vector<128x16xbf16>, vector<16x16xf32> -> vector<16x16xf32>
    %cst_13 = arith.constant dense<0xFF800000> : vector<16xf32>
    %27 = vector.multi_reduction <maximumf>, %26, %cst_13 [1] : vector<16x16xf32> to vector<16xf32>
    %28 = vector.shape_cast %27 : vector<16xf32> to vector<16x1xf32>
    %29 = vector.broadcast %28 : vector<16x1xf32> to vector<16x16xf32>
    %30 = arith.subf %26, %29 : vector<16x16xf32>
    %31 = math.exp %30 : vector<16x16xf32>
    %cst_14 = arith.constant dense<0.000000e+00> : vector<16xf32>
    %32 = vector.multi_reduction <add>, %31, %cst_14 [1] : vector<16x16xf32> to vector<16xf32>
    %33 = vector.shape_cast %32 : vector<16xf32> to vector<16x1xf32>
    %34 = arith.truncf %31 : vector<16x16xf32> to vector<16x16xbf16>
    %c0_15 = arith.constant 0 : index
    %c0_16 = arith.constant 0 : index
    %35 = vector.load %arg12[%c0_15, %c0_16] : memref<16x64xbf16, #tpu.memory_space<vmem>>, vector<16x64xbf16>
    %cst_17 = arith.constant dense<0.000000e+00> : vector<16x64xf32>
    %36 = tpu.matmul %34, %35, %cst_17 {dimension_numbers = #tpu.dot_dimension_numbers<[1], [0], [0], [1], [0, 0, 1, 1], [], []>} : vector<16x16xbf16>, vector<16x64xbf16>, vector<16x64xf32> -> vector<16x64xf32>
    %37 = tpu.reciprocal %33 {approx = true} : vector<16x1xf32> -> vector<16x1xf32>
    %38 = vector.broadcast %37 : vector<16x1xf32> to vector<16x64xf32>
    %39 = arith.mulf %36, %38 : vector<16x64xf32>
    %40 = arith.mulf %13, %39 : vector<16x64xf32>
    %41 = arith.truncf %40 : vector<16x64xf32> to vector<16x64xbf16>
    %c0_18 = arith.constant 0 : index
    %c0_19 = arith.constant 0 : index
    %42 = vector.load %arg7[%c0_18, %c0_19] : memref<64x32xbf16, #tpu.memory_space<vmem>>, vector<64x32xbf16>
    %cst_20 = arith.constant dense<0.000000e+00> : vector<16x32xf32>
    %43 = tpu.matmul %41, %42, %cst_20 {dimension_numbers = #tpu.dot_dimension_numbers<[1], [0], [0], [1], [0, 0, 1, 1], [], []>} : vector<16x64xbf16>, vector<64x32xbf16>, vector<16x32xf32> -> vector<16x32xf32>
    %44 = arith.addf %4, %43 : vector<16x32xf32>
    %45 = arith.mulf %44, %44 : vector<16x32xf32>
    %cst_21 = arith.constant dense<0.000000e+00> : vector<16xf32>
    %46 = vector.multi_reduction <add>, %45, %cst_21 [1] : vector<16x32xf32> to vector<16xf32>
    %47 = vector.shape_cast %46 : vector<16xf32> to vector<16x1xf32>
    %cst_22 = arith.constant 3.200000e+01 : f32
    %48 = vector.broadcast %cst_22 : f32 to vector<16x1xf32>
    %49 = arith.divf %47, %48 : vector<16x1xf32>
    %cst_23 = arith.constant 9.99999996E-13 : f32
    %50 = vector.broadcast %cst_23 : f32 to vector<16x1xf32>
    %51 = arith.addf %49, %50 : vector<16x1xf32>
    %52 = math.rsqrt %51 : vector<16x1xf32>
    %53 = vector.broadcast %52 : vector<16x1xf32> to vector<16x32xf32>
    %54 = arith.mulf %44, %53 : vector<16x32xf32>
    %c0_24 = arith.constant 0 : index
    %c0_25 = arith.constant 0 : index
    %c0_26 = arith.constant 0 : index
    %55 = vector.load %arg9[%c0_24, %c0_25, %c0_26] : memref<1x16x32xf32, #tpu.memory_space<vmem>>, vector<1x16x32xf32>
    %56 = vector.shape_cast %55 : vector<1x16x32xf32> to vector<16x32xf32>
    %57 = vector.shape_cast %54 : vector<16x32xf32> to vector<1x16x32xf32>
    tpu.vector_store %arg9[%c0_24, %c0_25, %c0_26], %57 {strides = array<i32>} : memref<1x16x32xf32, #tpu.memory_space<vmem>>, vector<1x16x32xf32>,
    return
  }
  func.func @transform_0(%arg0: i32, %arg1: i32) -> (i32, i32, i32) {
    %c0_i32 = arith.constant 0 : i32
    %c0_i32_0 = arith.constant 0 : i32
    %c0_i32_1 = arith.constant 0 : i32
    return %arg0, %c0_i32, %c0_i32_0 : i32, i32, i32
  }
  func.func @transform_1(%arg0: i32, %arg1: i32) -> (i32, i32, i32) {
    %c0_i32 = arith.constant 0 : i32
    %c0_i32_0 = arith.constant 0 : i32
    return %arg0, %arg1, %c0_i32 : i32, i32, i32
  }
  func.func @transform_2(%arg0: i32, %arg1: i32) -> (i32, i32) {
    %c0_i32 = arith.constant 0 : i32
    %c0_i32_0 = arith.constant 0 : i32
    %c0_i32_1 = arith.constant 0 : i32
    return %c0_i32, %c0_i32_0 : i32, i32
  }
  func.func @transform_3(%arg0: i32, %arg1: i32) -> (i32, i32) {
    %c0_i32 = arith.constant 0 : i32
    %c0_i32_0 = arith.constant 0 : i32
    %c0_i32_1 = arith.constant 0 : i32
    return %c0_i32, %c0_i32_0 : i32, i32
  }
  func.func @transform_4(%arg0: i32, %arg1: i32) -> (i32, i32) {
    %c0_i32 = arith.constant 0 : i32
    %c0_i32_0 = arith.constant 0 : i32
    %c0_i32_1 = arith.constant 0 : i32
    return %c0_i32, %c0_i32_0 : i32, i32
  }
  func.func @transform_5(%arg0: i32, %arg1: i32) -> (i32, i32) {
    %c0_i32 = arith.constant 0 : i32
    %c0_i32_0 = arith.constant 0 : i32
    %c0_i32_1 = arith.constant 0 : i32
    return %c0_i32, %c0_i32_0 : i32, i32
  }
  func.func @transform_6(%arg0: i32, %arg1: i32) -> (i32, i32) {
    %c0_i32 = arith.constant 0 : i32
    %c0_i32_0 = arith.constant 0 : i32
    %c0_i32_1 = arith.constant 0 : i32
    return %c0_i32, %c0_i32_0 : i32, i32
  }
  func.func @transform_7(%arg0: i32, %arg1: i32) -> (i32, i32, i32) {
    %c0_i32 = arith.constant 0 : i32
    %c0_i32_0 = arith.constant 0 : i32
    return %arg0, %arg1, %c0_i32 : i32, i32, i32
  }
}

</mosaic_0001>

<bundles_post_ra>
// kernel: tpu_custom_call.1
= control target key start
LH: loop header
LB: loop body
LE: loop exit
PB: predicated region body
PF: predicated region fallthrough
CT: control target
= control target key end

     0   :  { %s1792_s0 = inlined_call_operand.vmem [shape: bf16[2,16,32], index: 0, kind: input, shape index: {}]   ;;  %s1793_s1 = inlined_call_operand.vmem [shape: f32[2,16,32], index: 1, kind: input, shape index: {}]   ;;  %s1794_s2 = inlined_call_operand.hbm [shape: bf16[32,64], index: 2, kind: input, shape index: {}]   ;;  %s1795_s3 = inlined_call_operand.hbm [shape: bf16[32,64], index: 3, kind: input, shape index: {}]   ;;  %s1796_s4 = inlined_call_operand.hbm [shape: bf16[32,128], index: 4, kind: input, shape index: {}]   ;;  %s1797_s5 = inlined_call_operand.vmem [shape: bf16[64,32], index: 5, kind: input, shape index: {}]   ;;  %s1798_s6 = inlined_call_operand.vmem [shape: f32[1,128], index: 6, kind: input, shape index: {}]   ;;  %s1799_s7 = inlined_call_operand.hbm [shape: f32[2,16,32], index: 7, kind: output, shape index: {}]  }
   0x1   :  { %1802 = sst [smem:[#allocation18_spill]] %s1795_s3 }
   0x2   :  { %12 = vsyncpa [#allocation6], 0 }
   0x3   :  { %13 = vsyncpa [#allocation9], 0 }
   0x4   :  { %14 = vsyncpa [#allocation7], 0 }
   0x5   :  { %16 = vsyncpa [#allocation7 + $0x1], 0  ;;  %s1577_s24 = smov 0   ;;  %s1579_s25 = smov 0  }
   0x6   :  { %s1581_s26 = smov 0   ;;  %s1583_s27 = smov 0  }
   0x7   :  { %s1585_s28 = smov 0   ;;  %s1587_s29 = smov 0  }
   0x8 LB: > { %1803 = sst [smem:[#allocation15_spill]] %s1523_s28  ;;  %s1073_s30 = sadd.s32 4294967295, %s1527_s29   ;;  %s1527_s29 = sphi %s1587_s29, %s22_s29   ;;  %s1523_s28 = sphi %s1585_s28, %s1816_s28   ;;  %s1519_s27 = sphi %s1583_s27, %s1815_s27   ;;  %s1515_s26 = sphi %s1581_s26, %s1819_s26   ;;  %s1511_s25 = sphi %s1579_s25, %s1818_s25   ;;  %s1507_s24 = sphi %s1577_s24, %s1817_s24  }
   0x9   : > { %s1074_s8 = sadd.s32 4294967294, %s1527_s29   ;;  %s34_s9 = sadd.s32 1, %s1523_s28 }
   0xa   : > { %s202_s10 = sadd.s32 1, %s1515_s26  ;;  %p36_p0 = scmp.ge.s32.totalorder %s34_s9, 2 }
   0xb   : > { %p212_p1 = scmp.ne.s32.totalorder %s1515_s26, %s1511_s25  ;;  %p213_p2 = scmp.eq.s32.totalorder %s1073_s30, 1 }
   0xc   : > { %p218_p3 = scmp.ne.s32.totalorder %s1511_s25, %s1507_s24  ;;  %s1821_s9 = smov (%p36_p0, %s34_s9), 0 }
   0xd   : > { %1804 = sst [smem:[#allocation16_spill]] %s1821_s9  ;;  %p1617_p4 = por %p213_p2, %p212_p1 }
   0xe   : > { %p219_p5 = scmp.eq.s32.totalorder %s1074_s8, 1  ;;  %s197_s12 = ssub.s32 %s1523_s28, %s1821_s9 }
   0xf   : > { %p1075_p6 = scmp.ge.s32.totalorder %s1527_s29, 1  ;;  %p200_p7 = scmp.eq.s32.totalorder %s197_s12, 0 }
  0x10   : > { %p1624_p8 = por %p219_p5, %p218_p3  ;;  %p226_p9 = scmp.lt.s32.totalorder %s1527_s29, 3 }
  0x11   : > { %s1630_s14 = scalar_select %p200_p7, %s1515_s26, %s202_s10  }
  0x12   : > { %p1632_p10 = pnand %p1075_p6, %p226_p9  ;;  %p1636_p11 = scmp.eq.s32.totalorder %s1073_s30, 0 }
  0x13   : > { %1807 = sst [smem:[#allocation17_spill]] %s1630_s14  ;;  %s1529_s21 = smov [#allocation8]  }
  0x14   : > { %p1235_p12 = pneg %p1632_p10  ;;  %s1810_s3 = sld [smem:[#allocation18_spill]] }
  0x15   : > { %s253_s22 = sshll.u32 %s1529_s21, 4  ;;  %s1530_s23 = smov 64   ;;  %s254_s22 = int_to_ptr.vmem [resolvable:$true] %s253_s22 }
  0x16   : > { %p1647_p13 = pnand %p1636_p11, %p1235_p12  ;;  %s1531_s30 = smov 4  }
  0x17   : > { %s237_s12 = sshll.u32 %s1794_s2, 4  ;;  %s1532_s17 = smov [#allocation5]   ;;  %s238_s12 = int_to_ptr.hbm [resolvable:$true] %s237_s12 }
  0x18   : > { %s239_s18 = sshll.u32 %s1532_s17, 4  ;;  %s265_s28 = sshll.u32 %s1796_s4, 4  ;;  %s240_s18 = int_to_ptr.vmem [resolvable:$true] %s239_s18  ;;  %s266_s28 = int_to_ptr.hbm [resolvable:$true] %s265_s28 }
  0x19   : > { %1238 = dma.hbm_to_vmem [thread:$0]  (!%p1647_p13), %s238_s12, 256, %s240_s18, [#allocation6], %s1530_s23, %s1530_s23, %s1531_s30  }
  0x1a   : > { %s251_s19 = sshll.u32 %s1810_s3, 4  ;;  %s1533_s21 = smov [#allocation10]   ;;  %s252_s19 = int_to_ptr.hbm [resolvable:$true] %s251_s19 }
  0x1b   : > { %1241 = dma.hbm_to_vmem [thread:$0]  (!%p1647_p13), %s252_s19, 256, %s254_s22, [#allocation9], %s1530_s23, %s1530_s23, %s1531_s30  }
  0x1c   : > { %s267_s14 = sshll.u32 %s1533_s21, 4  ;;  %310 = sbr.rel (%p1632_p10) target bundleno = 1231 (0x4cf), region = 48  ;;  %s268_s14 = int_to_ptr.vmem [resolvable:$true] %s267_s14 }
  0x1d   : > { %1244 = dma.hbm_to_vmem [thread:$0]  (!%p1647_p13), %s266_s28, 256, %s268_s14, [#allocation9], %s1530_s23, %s1530_s23, %s1531_s30  }
  0x21   : > { %1494 = dma.done.wait (%p1636_p11), [#allocation6], 256  }
  0x22   : > { %1496 = vsyncadd (%p1636_p11), [#allocation6], 4294967040 }
  0x23   : > { %1498 = dma.done.wait (%p1636_p11), [#allocation9], 512  }
  0x24   : > { %1500 = vsyncadd (%p1636_p11), [#allocation9], 4294966784  ;;  %p362_p0 = scmp.lt.s32.totalorder %s1519_s27, 1  ;;  %v1189_v0 = vld [vmem:[#allocation10 + $0x8] sm:$0xff]  ;;  %v1188_v1 = vld [vmem:[#allocation10] sm:$0xff]  ;;  %vm406_vm0 = vcmask 261120  }
  0x25   : > { %416 = vmatpush.bf16.msra.mxu0 %v1189_v0  ;;  %v698_v26 = vld [vmem:[%s1798_s6] sm:$0x1]  ;;  %vm595_vm9 = vcmask 125952   ;;  %vm784_vm10 = vcmask 130048   ;;  %s359_s9 = sand.u32 1, %s1511_s25   ;;  %s1461_s18 = scalar_lea.hbm %s1799_s7, 32 }
  0x26   : > { %s1675_s3 = scalar_select %p362_p0, %s1519_s27, 1  ;;  %v699_v31 = vmul.f32 0.07856742, %v698_v26 }
  0x27   : > { %s1084_s14 = sshll.u32 %s359_s9, 4 }
  0x28   : > { %s1185_s28 = sshll.u32 %s1675_s3, 3  ;;  %v701_v36 = vperm.slane %v699_v31, 0  ;;  %s1186_s20 = sshll.u32 %s1675_s3, 4 }
  0x29   : > { %s366_s15 = scalar_lea.vmem %s1792_s0, %s1185_s28  ;;  %417 = vmatpush.bf16.msra.mxu0 %v1188_v1  ;;  %s375_s30 = scalar_lea.vmem %s1793_s1, %s1186_s20 }
  0x2a   : > { %v1681_v2 = vld [vmem:[%s366_s15] sm:$0xff]  ;;  %s1207_s15 = sshll.u32 %s1519_s27, 4  ;;  %s361_s22 = scalar_lea.vmem [#allocation11], %s1084_s14 }
  0x2b   : > { %s945_s20 = scalar_lea.hbm %s1799_s7, %s1207_s15  ;;  %s946_s23 = sshll.u32 %s361_s22, 4  ;;  %s947_s23 = int_to_ptr.vmem [resolvable:$true] %s946_s23 }
  0x2c   : > { %1101 = vmatmul.msk.bf16.vlgmr.msra.gmra.mxu0 %vm406_vm0, %v1681_v2  ;;  %s932_s27 = scalar_lea.sflag [#allocation7], %s359_s9 }
  0xa9   : > { %v419_v3 = vpop.f32.mrf.mxu0 }
  0xaa   : > { %v1102_v4 = vmul.f32 -1.442695, %v419_v3 }
  0xac   : > { %1313 = vpow2.f32 %v1102_v4 }
  0xb1   : > { %v421_v5 = vpop.f32.mrf.mxu0 }
  0xb2   : > { %v1314_v6 = vpop.eup %1313  ;;  %v1103_v7 = vmul.f32 -1.442695, %v421_v5 }
  0xb3   : > { %v430_v8 = vadd.f32 1.0, %v1314_v6 }
  0xb4   : > { %1315 = vpow2.f32 %v1103_v7 }
  0xb5   : > { %1317 = vrcp.f32 %v430_v8  ;;  %v443_v18 = vand.u32 2147483648, %v430_v8  ;;  %vm437_vm2 = vweird.f32 %v430_v8  ;;  %v441_v19 = vand.u32 2147483647, %v430_v8 }
  0xb7   : > { %v444_v25 = vor.u32 1.1754944e-38, %v443_v18  ;;  %vm442_vm5 = vcmp.eq.f32.partialorder %v441_v19, 8.507059e+37 }
  0xba   : > { %v1316_v9 = vpop.eup %1315 }
  0xbb   : > { %v1318_v10 = vpop.eup %1317  ;;  %v431_v11 = vadd.f32 1.0, %v1316_v9 }
  0xbc   : > { %v433_v12 = vmul.f32 %v1318_v10, %v430_v8  ;;  %vm438_vm1 = vweird.f32 %v1318_v10 }
  0xbd   : > { %1319 = vrcp.f32 %v431_v11  ;;  %vm439_vm3 = vmor %vm437_vm2, %vm438_vm1  ;;  %v458_v21 = vand.u32 2147483648, %v431_v11  ;;  %v456_v24 = vand.u32 2147483647, %v431_v11  ;;  %vm452_vm6 = vweird.f32 %v431_v11 }
  0xbe   : > { %v434_v13 = vsub.f32 1.0, %v433_v12  ;;  %v1191_v12 = vld [vmem:[#allocation8 + $0x8] sm:$0xff]  ;;  %vm540_vm2 = vcmask 519168  }
  0xbf   : > { %v459_v29 = vor.u32 1.1754944e-38, %v458_v21  ;;  %vm457_vm8 = vcmp.eq.f32.partialorder %v456_v24, 8.507059e+37  ;;  %486 = vmatpush.bf16.msra.mxu1 %v1191_v12  ;;  %v1206_v12 = vld [vmem:[%s1797_s5 + $0x18] sm:$0xff] }
  0xc0   : > { %v435_v14 = vmul.f32 %v1318_v10, %v434_v13  ;;  %v1190_v13 = vld [vmem:[#allocation8] sm:$0xff] }
  0xc2   : > { %v436_v16 = vadd.f32 %v1318_v10, %v435_v14 }
  0xc3   : > { %v1320_v15 = vpop.eup %1319  ;;  %487 = vmatpush.bf16.msra.mxu1 %v1190_v13 }
  0xc4   : > { %v448_v17 = vmul.f32 %v1320_v15, %v431_v11  ;;  %v440_v22 = vsel %vm439_vm3, %v1318_v10, %v436_v16  ;;  %vm453_vm4 = vweird.f32 %v1320_v15 }
  0xc5   : > { %v445_v28 = vsel %vm442_vm5, %v444_v25, %v440_v22  ;;  %vm454_vm7 = vmor %vm452_vm6, %vm453_vm4  ;;  %v1193_v25 = vld [vmem:[#allocation5 + $0x8] sm:$0xff] }
  0xc6   : > { %v449_v20 = vsub.f32 1.0, %v448_v17  ;;  %v462_v33 = vmul.f32 %v445_v28, %v419_v3  ;;  %1112 = vmatmul.msk.bf16.vlgmr.msra.gmra.mxu1 %vm406_vm0, %v1681_v2  ;;  %641 = vmatpush.bf16.msra.mxu2 %v1193_v25  ;;  %v1719_v28 = vld [vmem:[%s375_s30] sm:$0xff] }
  0xc7   : > { %876 = vmatpush.bf16.msrb.mxu1 %v1206_v12 }
  0xc8   : > { %v450_v23 = vmul.f32 %v1320_v15, %v449_v20 }
  0xca   : > { %v451_v27 = vadd.f32 %v1320_v15, %v450_v23 }
  0xcc   : > { %v455_v30 = vsel %vm454_vm7, %v1320_v15, %v451_v27  ;;  %v1192_v27 = vld [vmem:[#allocation5] sm:$0xff] }
  0xcd   : > { %v460_v32 = vsel %vm457_vm8, %v459_v29, %v455_v30  ;;  %v1721_v29 = vld [vmem:[%s375_s30 + $0x8] sm:$0xff]  ;;  %642 = vmatpush.bf16.msra.mxu2 %v1192_v27  ;;  %s948_s30 = sshll.u32 %s945_s20, 4  ;;  %s949_s30 = int_to_ptr.hbm [resolvable:$true] %s948_s30 }
  0xce   : > { %v463_v34 = vmul.f32 %v460_v32, %v421_v5  ;;  %v614_v30 = vpack.c.bf16 %v1721_v29, %v1719_v28  ;;  %s1455_s8 = sshra.s32 %s949_s30, 4  ;;  %s1456_s8 = int_to_ptr.hbm [resolvable:$true] %s1455_s8 }
  0xcf   : > { %s1457_s10 = scalar_lea.hbm %s1456_s8, 16  ;;  %p1462_p5 = scmp.lt.s32.totalorder %s1456_s8, %s1799_s7 }
  0xd0   : > { %v1211_v35 = vpack.c.bf16 %v463_v34, %v462_v33  ;;  %1123 = vmatmul.msk.bf16.vlgmr.msra.gmra.mxu2 %vm406_vm0, %v614_v30  ;;  %p1458_p1 = scmp.ne.s32.totalorder %s1456_s8, %s1457_s10  ;;  %p1463_p6 = scmp.lt.s32.totalorder %s1461_s18, %s1457_s10 }
  0xd2   : > { %v1215_v37 = vunpack.c.l.bf16 %v1211_v35  ;;  %v1216_v38 = vunpack.c.h.bf16 %v1211_v35  ;;  %p1459_p2 = pnand %p1458_p1, %p1617_p4  ;;  %p1464_p7 = por %p1463_p6, %p1462_p5 }
  0xd4   : > { %547 = vxpose.xlu0.b32.start [1/2] (short) %v1215_v37, 128  ;;  %v1688_v39 = vmul.f32 %v1215_v37, %v701_v36  ;;  %v1690_v40 = vmul.f32 %v1216_v38, %v701_v36  ;;  %p1460_p3 = pneg %p1459_p2 }
  0xd6   : > { %v705_v41 = vpack.c.bf16 %v1690_v40, %v1688_v39  ;;  %p1465_p9 = pnand %p1464_p7, %p1460_p3 }
  0xdc   : > { %548 = vxpose.xlu0.b32.end [2/2] (short) %v1216_v38, 128 }
 0x143   : > { %v489_v21 = vpop.f32.mrf.mxu1 }
 0x144   : > { %v1113_v22 = vmul.f32 -1.442695, %v489_v21 }
 0x146   : > { %1321 = vpow2.f32 %v1113_v22 }
 0x14b   : > { %v491_v23 = vpop.f32.mrf.mxu1 }
 0x14c   : > { %v1322_v2 = vpop.eup %1321  ;;  %v1114_v24 = vmul.f32 -1.442695, %v491_v23 }
 0x14d   : > { %v500_v26 = vadd.f32 1.0, %v1322_v2 }
 0x14e   : > { %1323 = vpow2.f32 %v1114_v24 }
 0x14f   : > { %1325 = vrcp.f32 %v500_v26  ;;  %v513_v35 = vand.u32 2147483648, %v500_v26  ;;  %vm507_vm11 = vweird.f32 %v500_v26  ;;  %v511_v37 = vand.u32 2147483647, %v500_v26 }
 0x151   : > { %vm512_vm14 = vcmp.eq.f32.partialorder %v511_v37, 8.507059e+37 }
 0x154   : > { %v1324_v31 = vpop.eup %1323 }
 0x155   : > { %v1326_v32 = vpop.eup %1325  ;;  %v501_v33 = vadd.f32 1.0, %v1324_v31 }
 0x156   : > { %v503_v34 = vmul.f32 %v1326_v32, %v500_v26  ;;  %vm508_vm12 = vweird.f32 %v1326_v32 }
 0x157   : > { %1327 = vrcp.f32 %v501_v33  ;;  %vm509_vm13 = vmor %vm507_vm11, %vm508_vm12  ;;  %vm522_vm15 = vweird.f32 %v501_v33 }
 0x158   : > { %v504_v36 = vsub.f32 1.0, %v503_v34 }
 0x15a   : > { %v505_v40 = vmul.f32 %v1326_v32, %v504_v36 }
 0x178   : > { %v563_v42 = vpop.trf.xlu0 }
 0x179   : > { %v579_v43 = vpack.c.bf16 %v563_v42, %v563_v42  ;;  %v506_v42 = vadd.f32 %v1326_v32, %v505_v40 }
 0x17b   : > { %596 = vst.msk [vmem:[#allocation3] sm:$0xf] %vm595_vm9, %v579_v43  ;;  %v1328_v43 = vpop.eup %1327 }
 0x17c   : > { %vm523_vm1 = vweird.f32 %v1328_v43 }
 0x17d   : > { %vm524_vm3 = vmor %vm522_vm15, %vm523_vm1 }
 0x180   : > { %v564_v44 = vpop.trf.xlu0 }
 0x181   : > { %v580_v45 = vpack.c.bf16 %v564_v44, %v564_v44  ;;  %v510_v44 = vsel %vm509_vm13, %v1326_v32, %v506_v42  ;;  %vm868_vm13 = vcmask 523264  }
 0x183   : > { %597 = vst.msk [vmem:[#allocation3 + $0x4] sm:$0xf] %vm595_vm9, %v580_v45  ;;  %v518_v45 = vmul.f32 %v1328_v43, %v501_v33 }
 0x188   : > { %v565_v46 = vpop.trf.xlu0 }
 0x189   : > { %v581_v47 = vpack.c.bf16 %v565_v46, %v565_v46 }
 0x18a   : > { %v1194_v20 = vld [vmem:[#allocation3] sm:$0xff] }
 0x18b   : > { %598 = vst.msk [vmem:[#allocation3 + $0x8] sm:$0xf] %vm595_vm9, %v581_v47  ;;  %v528_v47 = vand.u32 2147483648, %v501_v33 }
 0x190   : > { %v566_v48 = vpop.trf.xlu0 }
 0x191   : > { %v582_v49 = vpack.c.bf16 %v566_v48, %v566_v48 }
 0x193   : > { %599 = vst.msk [vmem:[#allocation3 + $0xc] sm:$0xf] %vm595_vm9, %v582_v49  ;;  %v519_v49 = vsub.f32 1.0, %v518_v45 }
 0x198   : > { %v567_v50 = vpop.trf.xlu0 }
 0x199   : > { %v583_v51 = vpack.c.bf16 %v567_v50, %v567_v50  ;;  %v526_v50 = vand.u32 2147483647, %v501_v33 }
 0x19a   : > { %v1195_v19 = vld [vmem:[#allocation3 + $0x8] sm:$0xff] }
 0x19b   : > { %600 = vst.msk [vmem:[#allocation3 + $0x10] sm:$0xf] %vm595_vm9, %v583_v51  ;;  %vm527_vm4 = vcmp.eq.f32.partialorder %v526_v50, 8.507059e+37 }
 0x1a0   : > { %v568_v52 = vpop.trf.xlu0 }
 0x1a1   : > { %v584_v53 = vpack.c.bf16 %v568_v52, %v568_v52 }
 0x1a3   : > { %601 = vst.msk [vmem:[#allocation3 + $0x14] sm:$0xf] %vm595_vm9, %v584_v53 }
 0x1a8   : > { %v569_v54 = vpop.trf.xlu0 }
 0x1a9   : > { %v585_v55 = vpack.c.bf16 %v569_v54, %v569_v54  ;;  %v520_v54 = vmul.f32 %v1328_v43, %v519_v49 }
 0x1aa   : > { %v1196_v18 = vld [vmem:[#allocation3 + $0x10] sm:$0xff] }
 0x1ab   : > { %602 = vst.msk [vmem:[#allocation3 + $0x18] sm:$0xf] %vm595_vm9, %v585_v55  ;;  %v529_v55 = vor.u32 1.1754944e-38, %v528_v47 }
 0x1b0   : > { %v570_v56 = vpop.trf.xlu0 }
 0x1b1   : > { %v586_v57 = vpack.c.bf16 %v570_v56, %v570_v56  ;;  %v521_v56 = vadd.f32 %v1328_v43, %v520_v54 }
 0x1b3   : > { %603 = vst.msk [vmem:[#allocation3 + $0x1c] sm:$0xf] %vm595_vm9, %v586_v57  ;;  %v525_v57 = vsel %vm524_vm3, %v1328_v43, %v521_v56 }
 0x1b8   : > { %v571_v58 = vpop.trf.xlu0 }
 0x1b9   : > { %v587_v59 = vpack.c.bf16 %v571_v58, %v571_v58  ;;  %v530_v58 = vsel %vm527_vm4, %v529_v55, %v525_v57 }
 0x1ba   : > { %v1197_v17 = vld [vmem:[#allocation3 + $0x18] sm:$0xff] }
 0x1bb   : > { %604 = vst.msk [vmem:[#allocation3 + $0x20] sm:$0xf] %vm595_vm9, %v587_v59  ;;  %v533_v59 = vmul.f32 %v530_v58, %v491_v23 }
 0x1c0   : > { %v572_v60 = vpop.trf.xlu0 }
 0x1c1   : > { %v588_v61 = vpack.c.bf16 %v572_v60, %v572_v60  ;;  %v537_v60 = vpack.c.bf16 %v533_v59, %v533_v59 }
 0x1c3   : > { %605 = vst.msk [vmem:[#allocation3 + $0x24] sm:$0xf] %vm595_vm9, %v588_v61 }
 0x1c4   : > { %542 = vst.msk [vmem:[#allocation4 + $0x4] sm:$0xf] %vm540_vm2, %v537_v60 }
 0x1c8   : > { %v573_v62 = vpop.trf.xlu0 }
 0x1c9   : > { %v589_v63 = vpack.c.bf16 %v573_v62, %v573_v62 }
 0x1ca   : > { %v1198_v16 = vld [vmem:[#allocation3 + $0x20] sm:$0xff] }
 0x1cb   : > { %606 = vst.msk [vmem:[#allocation3 + $0x28] sm:$0xf] %vm595_vm9, %v589_v63 }
 0x1d0   : > { %v574_v0 = vpop.trf.xlu0 }
 0x1d1   : > { %v590_v1 = vpack.c.bf16 %v574_v0, %v574_v0 }
 0x1d3   : > { %607 = vst.msk [vmem:[#allocation3 + $0x2c] sm:$0xf] %vm595_vm9, %v590_v1 }
 0x1d8   : > { %v575_v3 = vpop.trf.xlu0 }
 0x1d9   : > { %v591_v4 = vpack.c.bf16 %v575_v3, %v575_v3 }
 0x1da   : > { %v1199_v15 = vld [vmem:[#allocation3 + $0x28] sm:$0xff] }
 0x1db   : > { %608 = vst.msk [vmem:[#allocation3 + $0x30] sm:$0xf] %vm595_vm9, %v591_v4 }
 0x1e0   : > { %v576_v5 = vpop.trf.xlu0 }
 0x1e1   : > { %v592_v6 = vpack.c.bf16 %v576_v5, %v576_v5 }
 0x1e3   : > { %609 = vst.msk [vmem:[#allocation3 + $0x34] sm:$0xf] %vm595_vm9, %v592_v6 }
 0x1e8   : > { %v577_v7 = vpop.trf.xlu0 }
 0x1e9   : > { %v593_v8 = vpack.c.bf16 %v577_v7, %v577_v7 }
 0x1ea   : > { %v1200_v14 = vld [vmem:[#allocation3 + $0x30] sm:$0xff] }
 0x1eb   : > { %610 = vst.msk [vmem:[#allocation3 + $0x38] sm:$0xf] %vm595_vm9, %v593_v8 }
 0x1f0   : > { %v578_v9 = vpop.trf.xlu0 }
 0x1f1   : > { %v594_v10 = vpack.c.bf16 %v578_v9, %v578_v9 }
 0x1f3   : > { %611 = vst.msk [vmem:[#allocation3 + $0x3c] sm:$0xf] %vm595_vm9, %v594_v10  ;;  %v644_v10 = vpop.f32.mrf.mxu2 }
 0x1f4   : > { %v1124_v13 = vmul.f32 -1.442695, %v644_v10 }
 0x1fa   : > { %v1201_v11 = vld [vmem:[#allocation3 + $0x38] sm:$0xff] }
 0x1fb   : > { %770 = vmatpush.bf16.msra.mxu3 %v1201_v11  ;;  %v646_v11 = vpop.f32.mrf.mxu2 }
 0x1ff   : > { %771 = vmatpush.bf16.msra.mxu3 %v1200_v14  ;;  %v1125_v14 = vmul.f32 -1.442695, %v646_v11 }
 0x203   : > { %772 = vmatpush.bf16.msra.mxu3 %v1199_v15 }
 0x207   : > { %773 = vmatpush.bf16.msra.mxu3 %v1198_v16  ;;  %v1205_v16 = vld [vmem:[%s1797_s5 + $0x10] sm:$0xff] }
 0x208   : > { %877 = vmatpush.bf16.msrb.mxu1 %v1205_v16 }
 0x20b   : > { %774 = vmatpush.bf16.msra.mxu3 %v1197_v17 }
 0x20f   : > { %775 = vmatpush.bf16.msra.mxu3 %v1196_v18  ;;  %v1204_v18 = vld [vmem:[%s1797_s5 + $0x8] sm:$0xff] }
 0x210   : > { %878 = vmatpush.bf16.msrb.mxu1 %v1204_v18 }
 0x213   : > { %776 = vmatpush.bf16.msra.mxu3 %v1195_v19 }
 0x217   : > { %777 = vmatpush.bf16.msra.mxu3 %v1194_v20 }
 0x21a   : > { %778 = vmatmul.bf16.vlgmr.msra.gmra.mxu3 %v705_v41  ;;  %v514_v41 = vor.u32 1.1754944e-38, %v513_v35 }
 0x21c   : > { %v515_v46 = vsel %vm512_vm14, %v514_v41, %v510_v44 }
 0x21d   : > { %v532_v48 = vmul.f32 %v515_v46, %v489_v21  ;;  %v1203_v21 = vld [vmem:[%s1797_s5] sm:$0xff] }
 0x21e   : > { %879 = vmatpush.bf16.msrb.mxu1 %v1203_v21 }
 0x21f   : > { %v536_v53 = vpack.c.bf16 %v532_v48, %v532_v48 }
 0x221   : > { %541 = vst.msk [vmem:[#allocation4] sm:$0xf] %vm540_vm2, %v536_v53 }
 0x228   : > { %v1202_v61 = vld [vmem:[#allocation4] sm:$0xff] }
 0x229   : > { %822 = vmatpush.bf16.msrb.mxu0 %v1202_v61 }
 0x29d   : > { %v779_v38 = vpop.f32.mrf.mxu3 }
 0x29e   : > { %v785_v39 = vsel %vm784_vm10, %v779_v38, -inf }
 0x29f   : > { %786 = vmax.xlane.f32.xlu1 %v785_v39 }
 0x2a5   : > { %v781_v51 = vpop.f32.mrf.mxu3 }
 0x2a6   : > { %v788_v52 = vsel %vm784_vm10, %v781_v51, -inf }
 0x2a7   : > { %789 = vmax.xlane.f32.xlu1 %v788_v52 }
 0x312   : > { %v787_v62 = vpop.xlane.xlu1 %786 }
 0x313   : > { %v791_v63 = vsub.f32 %v779_v38, %v787_v62 }
 0x315   : > { %v793_v0 = vmul.f32 1.442695, %v791_v63 }
 0x317   : > { %1329 = vpow2.f32 %v793_v0 }
 0x31a   : > { %v790_v1 = vpop.xlane.xlu1 %789 }
 0x31b   : > { %v792_v3 = vsub.f32 %v781_v51, %v790_v1  ;;  %v1534_v1 = vmov 32.0  }
 0x31d   : > { %v1330_v4 = vpop.eup %1329  ;;  %v795_v5 = vmul.f32 1.442695, %v792_v3 }
 0x31e   : > { %v797_v6 = vsel %vm784_vm10, %v1330_v4, 0.0 }
 0x31f   : > { %1331 = vpow2.f32 %v795_v5  ;;  %798 = vadd.xlane.f32.xlu2 %v797_v6 }
 0x320   : > { %1333 = vpow2.f32 %v1124_v13 }
 0x321   : > { %1335 = vpow2.f32 %v1125_v14 }
 0x325   : > { %v1332_v7 = vpop.eup %1331 }
 0x326   : > { %v800_v8 = vsel %vm784_vm10, %v1332_v7, 0.0  ;;  %v803_v9 = vpack.c.bf16 %v1332_v7, %v1330_v4  ;;  %v1334_v15 = vpop.eup %1333 }
 0x327   : > { %801 = vadd.xlane.f32.xlu2 %v800_v8  ;;  %v1336_v17 = vpop.eup %1335  ;;  %v655_v19 = vadd.f32 1.0, %v1334_v15 }
 0x328   : > { %1162 = vmatmul.msk.bf16.vlgmr.msrb.gmra.mxu0 %vm784_vm10, %v803_v9  ;;  %v656_v20 = vadd.f32 1.0, %v1336_v17 }
 0x329   : > { %1337 = vrcp.f32 %v655_v19  ;;  %vm662_vm5 = vweird.f32 %v655_v19  ;;  %v668_v32 = vand.u32 2147483648, %v655_v19  ;;  %v666_v36 = vand.u32 2147483647, %v655_v19 }
 0x32a   : > { %1339 = vrcp.f32 %v656_v20  ;;  %vm677_vm7 = vweird.f32 %v656_v20  ;;  %v683_v33 = vand.u32 2147483648, %v656_v20  ;;  %v681_v38 = vand.u32 2147483647, %v656_v20 }
 0x32b   : > { %v669_v41 = vor.u32 1.1754944e-38, %v668_v32  ;;  %vm667_vm11 = vcmp.eq.f32.partialorder %v666_v36, 8.507059e+37 }
 0x32c   : > { %v684_v42 = vor.u32 1.1754944e-38, %v683_v33  ;;  %vm682_vm12 = vcmp.eq.f32.partialorder %v681_v38, 8.507059e+37 }
 0x32f   : > { %v1338_v22 = vpop.eup %1337 }
 0x330   : > { %v1340_v23 = vpop.eup %1339  ;;  %v658_v2 = vmul.f32 %v1338_v22, %v655_v19  ;;  %vm663_vm6 = vweird.f32 %v1338_v22 }
 0x331   : > { %v673_v24 = vmul.f32 %v1340_v23, %v656_v20  ;;  %vm678_vm8 = vweird.f32 %v1340_v23  ;;  %vm1743_vm9 = vmor %vm662_vm5, %vm663_vm6 }
 0x332   : > { %v659_v26 = vsub.f32 1.0, %v658_v2  ;;  %vm679_vm10 = vmor %vm677_vm7, %vm678_vm8 }
 0x333   : > { %v674_v27 = vsub.f32 1.0, %v673_v24 }
 0x334   : > { %v660_v30 = vmul.f32 %v1338_v22, %v659_v26 }
 0x335   : > { %v675_v31 = vmul.f32 %v1340_v23, %v674_v27 }
 0x336   : > { %v661_v34 = vadd.f32 %v1338_v22, %v660_v30 }
 0x337   : > { %v676_v37 = vadd.f32 %v1340_v23, %v675_v31 }
 0x338   : > { %v665_v43 = vsel %vm1743_vm9, %v1338_v22, %v661_v34 }
 0x339   : > { %v680_v44 = vsel %vm679_vm10, %v1340_v23, %v676_v37  ;;  %v670_v46 = vsel %vm667_vm11, %v669_v41, %v665_v43 }
 0x33a   : > { %v685_v47 = vsel %vm682_vm12, %v684_v42, %v680_v44  ;;  %v687_v51 = vmul.f32 %v670_v46, %v644_v10 }
 0x33b   : > { %v688_v52 = vmul.f32 %v685_v47, %v646_v11 }
 0x392   : > { %v799_v25 = vpop.xlane.xlu2 %798 }
 0x393   : > { %1341 = vrcp.f32 %v799_v25 }
 0x399   : > { %v1342_v45 = vpop.eup %1341 }
 0x39a   : > { %v802_v39 = vpop.xlane.xlu2 %801 }
 0x39b   : > { %1343 = vrcp.f32 %v802_v39 }
 0x39c   : > { %1345 = vrcp.f32 %v1534_v1 }
 0x3a1   : > { %v1344_v49 = vpop.eup %1343 }
 0x3a2   : > { %v1346_v3 = vpop.eup %1345 }
 0x3a3   : > { %v897_v4 = vmul.f32 32.0, %v1346_v3  ;;  %vm901_vm14 = vweird.f32 %v1346_v3 }
 0x3a5   : > { %v824_v40 = vpop.f32.mrf.mxu0  ;;  %v898_v5 = vsub.f32 1.0, %v897_v4 }
 0x3a6   : > { %v831_v48 = vmul.f32 %v1342_v45, %v824_v40 }
 0x3a7   : > { %v899_v6 = vmul.f32 %v1346_v3, %v898_v5 }
 0x3a8   : > { %v833_v54 = vmul.f32 %v831_v48, %v687_v51 }
 0x3a9   : > { %v900_v7 = vadd.f32 %v1346_v3, %v899_v6 }
 0x3ad   : > { %v826_v50 = vpop.f32.mrf.mxu0 }
 0x3ae   : > { %v832_v53 = vmul.f32 %v1344_v49, %v826_v50 }
 0x3b0   : > { %v834_v55 = vmul.f32 %v832_v53, %v688_v52 }
 0x3b2   : > { %v835_v56 = vpack.c.bf16 %v834_v55, %v833_v54 }
 0x3b4   : > { %1179 = vmatmul.msk.bf16.vlgmr.msrb.gmra.mxu1 %vm868_vm13, %v835_v56 }
 0x431   : > { %v881_v57 = vpop.f32.mrf.mxu1 }
 0x432   : > { %v886_v58 = vadd.f32 %v881_v57, %v1719_v28  ;;  %v902_v28 = vsel %vm901_vm14, %v1346_v3, %v900_v7 }
 0x434   : > { %v888_v59 = vmul.f32 %v886_v58, %v886_v58 }
 0x436   : > { %v890_v60 = vsel %vm406_vm0, %v888_v59, 0.0 }
 0x437   : > { %891 = vadd.xlane.f32.xlu0 %v890_v60 }
 0x439   : > { %v883_v61 = vpop.f32.mrf.mxu1 }
 0x43a   : > { %v887_v62 = vadd.f32 %v883_v61, %v1721_v29 }
 0x43c   : > { %v889_v63 = vmul.f32 %v887_v62, %v887_v62 }
 0x43e   : > { %v893_v0 = vsel %vm406_vm0, %v889_v63, 0.0 }
 0x43f   : > { %894 = vadd.xlane.f32.xlu1 %v893_v0 }
 0x4aa   : > { %v892_v8 = vpop.xlane.xlu0 %891 }
 0x4ab   : > { %v903_v9 = vmul.f32 %v902_v28, %v892_v8 }
 0x4ad   : > { %v905_v10 = vadd.f32 1e-12, %v903_v9 }
 0x4af   : > { %1347 = vrsqrt.f32 %v905_v10  ;;  %vm913_vm1 = vweird.f32 %v905_v10 }
 0x4b2   : > { %v895_v11 = vpop.xlane.xlu1 %894 }
 0x4b3   : > { %v904_v29 = vmul.f32 %v902_v28, %v895_v11 }
 0x4b5   : > { %v1348_v12 = vpop.eup %1347  ;;  %v906_v13 = vadd.f32 1e-12, %v904_v29 }
 0x4b6   : > { %v908_v14 = vmul.f32 %v1348_v12, %v905_v10  ;;  %vm914_vm15 = vweird.f32 %v1348_v12 }
 0x4b7   : > { %1349 = vrsqrt.f32 %v906_v13  ;;  %vm915_vm2 = vmor %vm913_vm1, %vm914_vm15  ;;  %vm923_vm4 = vweird.f32 %v906_v13 }
 0x4b8   : > { %v909_v15 = vmul.f32 %v1348_v12, %v908_v14 }
 0x4ba   : > { %v910_v16 = vmul.f32 0.5, %v909_v15 }
 0x4bc   : > { %v911_v17 = vsub.f32 1.5, %v910_v16 }
 0x4bd   : > { %v1350_v18 = vpop.eup %1349 }
 0x4be   : > { %v912_v19 = vmul.f32 %v1348_v12, %v911_v17  ;;  %v918_v20 = vmul.f32 %v1350_v18, %v906_v13  ;;  %vm924_vm3 = vweird.f32 %v1350_v18 }
 0x4bf   : > { %vm925_vm5 = vmor %vm923_vm4, %vm924_vm3 }
 0x4c0   : > { %v916_v21 = vsel %vm915_vm2, %v1348_v12, %v912_v19  ;;  %v919_v22 = vmul.f32 %v1350_v18, %v918_v20 }
 0x4c1   : > { %v927_v23 = vmul.f32 %v916_v21, %v886_v58 }
 0x4c2   : > { %v920_v2 = vmul.f32 0.5, %v919_v22 }
 0x4c3   : > { %929 = vst.msk [vmem:[%s361_s22] sm:$0xff] %vm406_vm0, %v927_v23 }
 0x4c4   : > { %v921_v24 = vsub.f32 1.5, %v920_v2 }
 0x4c6   : > { %v922_v25 = vmul.f32 %v1350_v18, %v921_v24 }
 0x4c8   : > { %v926_v26 = vsel %vm925_vm5, %v1350_v18, %v922_v25 }
 0x4c9   : > { %v928_v27 = vmul.f32 %v926_v26, %v887_v62 }
 0x4cb   : > { %930 = vst.msk [vmem:[%s361_s22 + $0x8] sm:$0xff] %vm406_vm0, %v928_v27 }
 0x4cc   : > { %1468 = shalt.err (!%p1465_p9)
}
 0x4cd   : > { %s1535_s28 = smov 128   ;;  %s1536_s9 = smov 8  }
 0x4ce   : > { %1233 = dma.vmem_to_hbm [thread:$0]  (%p1617_p4), %s947_s23, 256, %s949_s30, %s932_s27, %s1535_s28, %s1535_s28, %s1536_s9  }
 0x4cf PF: > { %p1255_p10 = scmp.ge.s32.totalorder %s1527_s29, 2  ;;  %s963_s14 = sand.u32 1, %s1507_s24  }
 0x4d0   : > { %s964_s15 = scalar_lea.sflag [#allocation7], %s963_s14 }
 0x4d1   : > { %p1246_p11 = pnand %p1255_p10, %p1624_p8 }
 0x4d3   : > { %p1247_p12 = pneg %p1246_p11 }
 0x4d5   : > { %1502 = dma.done.wait (%p1247_p12), %s964_s15, 256  }
 0x4d6   : > { %1504 = vsyncadd (%p1247_p12), %s964_s15, 4294967040  ;;  %s22_s29 = sadd.s32 1, %s1527_s29   ;;  %s1814_s16 = sld [smem:[#allocation17_spill]] }
 0x4d7   : > { %p19_p13 = scmp.ge.s32.totalorder %s22_s29, 4   ;;  %s1815_s27 = sld [smem:[#allocation15_spill]] }
 0x4d8   : > { %s1816_s28 = sld [smem:[#allocation16_spill]]  ;;  %s1817_s24 = smov %s1511_s25 }
 0x4d9   : > { %s1818_s25 = smov %s1515_s26  ;;  %21 = sbr.rel (!%p19_p13) target bundleno = 8 (0x8), region = 104 }
 0x4dc   : > { %s1819_s26 = smov %s1814_s16 }
 0x4de   :  { %970 = vsyncpa [#allocation6], 1 }
 0x4df   :  { %972 = vsyncpa [#allocation6 + $0x1], 1 }
 0x4e0   :  { %973 = vsyncpa [#allocation9], 1 }
 0x4e1   :  { %974 = vsyncpa [#allocation7], 1 }
 0x4e2   :  { %976 = vsyncpa [#allocation7 + $0x1], 1 }

// kernel: tpu_custom_call.1
= control target key start
LH: loop header
LB: loop body
LE: loop exit
PB: predicated region body
PF: predicated region fallthrough
CT: control target
= control target key end

     0   :  { %s1792_s0 = inlined_call_operand.vmem [shape: bf16[2,16,32], index: 0, kind: input, shape index: {}]   ;;  %s1793_s1 = inlined_call_operand.vmem [shape: f32[2,16,32], index: 1, kind: input, shape index: {}]   ;;  %s1794_s2 = inlined_call_operand.hbm [shape: bf16[32,64], index: 2, kind: input, shape index: {}]   ;;  %s1795_s3 = inlined_call_operand.hbm [shape: bf16[32,64], index: 3, kind: input, shape index: {}]   ;;  %s1796_s4 = inlined_call_operand.hbm [shape: bf16[32,128], index: 4, kind: input, shape index: {}]   ;;  %s1797_s5 = inlined_call_operand.vmem [shape: bf16[64,32], index: 5, kind: input, shape index: {}]   ;;  %s1798_s6 = inlined_call_operand.vmem [shape: f32[1,128], index: 6, kind: input, shape index: {}]   ;;  %s1799_s7 = inlined_call_operand.hbm [shape: f32[2,16,32], index: 7, kind: output, shape index: {}]  }
   0x1   :  { %1802 = sst [smem:[#allocation18_spill]] %s1795_s3 }
   0x2   :  { %12 = vsyncpa [#allocation6], 0 }
   0x3   :  { %13 = vsyncpa [#allocation9], 0 }
   0x4   :  { %14 = vsyncpa [#allocation7], 0 }
   0x5   :  { %16 = vsyncpa [#allocation7 + $0x1], 0  ;;  %s1577_s24 = smov 0   ;;  %s1579_s25 = smov 0  }
   0x6   :  { %s1581_s26 = smov 0   ;;  %s1583_s27 = smov 0  }
   0x7   :  { %s1585_s28 = smov 0   ;;  %s1587_s29 = smov 0  }
   0x8 LB: > { %1803 = sst [smem:[#allocation15_spill]] %s1523_s28  ;;  %s1073_s30 = sadd.s32 4294967295, %s1527_s29   ;;  %s1527_s29 = sphi %s1587_s29, %s22_s29   ;;  %s1523_s28 = sphi %s1585_s28, %s1816_s28   ;;  %s1519_s27 = sphi %s1583_s27, %s1815_s27   ;;  %s1515_s26 = sphi %s1581_s26, %s1819_s26   ;;  %s1511_s25 = sphi %s1579_s25, %s1818_s25   ;;  %s1507_s24 = sphi %s1577_s24, %s1817_s24  }
   0x9   : > { %s1074_s8 = sadd.s32 4294967294, %s1527_s29   ;;  %s34_s9 = sadd.s32 1, %s1523_s28 }
   0xa   : > { %s202_s10 = sadd.s32 1, %s1515_s26  ;;  %p36_p0 = scmp.ge.s32.totalorder %s34_s9, 2 }
   0xb   : > { %p212_p1 = scmp.ne.s32.totalorder %s1515_s26, %s1511_s25  ;;  %p213_p2 = scmp.eq.s32.totalorder %s1073_s30, 1 }
   0xc   : > { %p218_p3 = scmp.ne.s32.totalorder %s1511_s25, %s1507_s24  ;;  %s1821_s9 = smov (%p36_p0, %s34_s9), 0 }
   0xd   : > { %1804 = sst [smem:[#allocation16_spill]] %s1821_s9  ;;  %p1617_p4 = por %p213_p2, %p212_p1 }
   0xe   : > { %p219_p5 = scmp.eq.s32.totalorder %s1074_s8, 1  ;;  %s197_s12 = ssub.s32 %s1523_s28, %s1821_s9 }
   0xf   : > { %p1075_p6 = scmp.ge.s32.totalorder %s1527_s29, 1  ;;  %p200_p7 = scmp.eq.s32.totalorder %s197_s12, 0 }
  0x10   : > { %p1624_p8 = por %p219_p5, %p218_p3  ;;  %p226_p9 = scmp.lt.s32.totalorder %s1527_s29, 3 }
  0x11   : > { %s1630_s14 = scalar_select %p200_p7, %s1515_s26, %s202_s10  }
  0x12   : > { %p1632_p10 = pnand %p1075_p6, %p226_p9  ;;  %p1636_p11 = scmp.eq.s32.totalorder %s1073_s30, 0 }
  0x13   : > { %1807 = sst [smem:[#allocation17_spill]] %s1630_s14  ;;  %s1529_s21 = smov [#allocation8]  }
  0x14   : > { %p1235_p12 = pneg %p1632_p10  ;;  %s1810_s3 = sld [smem:[#allocation18_spill]] }
  0x15   : > { %s253_s22 = sshll.u32 %s1529_s21, 4  ;;  %s1530_s23 = smov 64   ;;  %s254_s22 = int_to_ptr.vmem [resolvable:$true] %s253_s22 }
  0x16   : > { %p1647_p13 = pnand %p1636_p11, %p1235_p12  ;;  %s1531_s30 = smov 4  }
  0x17   : > { %s237_s12 = sshll.u32 %s1794_s2, 4  ;;  %s1532_s17 = smov [#allocation5]   ;;  %s238_s12 = int_to_ptr.hbm [resolvable:$true] %s237_s12 }
  0x18   : > { %s239_s18 = sshll.u32 %s1532_s17, 4  ;;  %s265_s28 = sshll.u32 %s1796_s4, 4  ;;  %s240_s18 = int_to_ptr.vmem [resolvable:$true] %s239_s18  ;;  %s266_s28 = int_to_ptr.hbm [resolvable:$true] %s265_s28 }
  0x19   : > { %1238 = dma.hbm_to_vmem [thread:$0]  (!%p1647_p13), %s238_s12, 256, %s240_s18, [#allocation6], %s1530_s23, %s1530_s23, %s1531_s30  }
  0x1a   : > { %s251_s19 = sshll.u32 %s1810_s3, 4  ;;  %s1533_s21 = smov [#allocation10]   ;;  %s252_s19 = int_to_ptr.hbm [resolvable:$true] %s251_s19 }
  0x1b   : > { %1241 = dma.hbm_to_vmem [thread:$0]  (!%p1647_p13), %s252_s19, 256, %s254_s22, [#allocation9], %s1530_s23, %s1530_s23, %s1531_s30  }
  0x1c   : > { %s267_s14 = sshll.u32 %s1533_s21, 4  ;;  %310 = sbr.rel (%p1632_p10) target bundleno = 1231 (0x4cf), region = 48  ;;  %s268_s14 = int_to_ptr.vmem [resolvable:$true] %s267_s14 }
  0x1d   : > { %1244 = dma.hbm_to_vmem [thread:$0]  (!%p1647_p13), %s266_s28, 256, %s268_s14, [#allocation9], %s1530_s23, %s1530_s23, %s1531_s30  }
  0x21   : > { %1494 = dma.done.wait (%p1636_p11), [#allocation6], 256  }
  0x22   : > { %1496 = vsyncadd (%p1636_p11), [#allocation6], 4294967040 }
  0x23   : > { %1498 = dma.done.wait (%p1636_p11), [#allocation9], 512  }
  0x24   : > { %1500 = vsyncadd (%p1636_p11), [#allocation9], 4294966784  ;;  %p362_p0 = scmp.lt.s32.totalorder %s1519_s27, 1  ;;  %v1189_v0 = vld [vmem:[#allocation10 + $0x8] sm:$0xff]  ;;  %v1188_v1 = vld [vmem:[#allocation10] sm:$0xff]  ;;  %vm406_vm0 = vcmask 261120  }
  0x25   : > { %416 = vmatpush.bf16.msra.mxu0 %v1189_v0  ;;  %v698_v26 = vld [vmem:[%s1798_s6] sm:$0x1]  ;;  %vm595_vm9 = vcmask 125952   ;;  %vm784_vm10 = vcmask 130048   ;;  %s359_s9 = sand.u32 1, %s1511_s25   ;;  %s1461_s18 = scalar_lea.hbm %s1799_s7, 32 }
  0x26   : > { %s1675_s3 = scalar_select %p362_p0, %s1519_s27, 1  ;;  %v699_v31 = vmul.f32 0.07856742, %v698_v26 }
  0x27   : > { %s1084_s14 = sshll.u32 %s359_s9, 4 }
  0x28   : > { %s1185_s28 = sshll.u32 %s1675_s3, 3  ;;  %v701_v36 = vperm.slane %v699_v31, 0  ;;  %s1186_s20 = sshll.u32 %s1675_s3, 4 }
  0x29   : > { %s366_s15 = scalar_lea.vmem %s1792_s0, %s1185_s28  ;;  %417 = vmatpush.bf16.msra.mxu0 %v1188_v1  ;;  %s375_s30 = scalar_lea.vmem %s1793_s1, %s1186_s20 }
  0x2a   : > { %v1681_v2 = vld [vmem:[%s366_s15] sm:$0xff]  ;;  %s1207_s15 = sshll.u32 %s1519_s27, 4  ;;  %s361_s22 = scalar_lea.vmem [#allocation11], %s1084_s14 }
  0x2b   : > { %s945_s20 = scalar_lea.hbm %s1799_s7, %s1207_s15  ;;  %s946_s23 = sshll.u32 %s361_s22, 4  ;;  %s947_s23 = int_to_ptr.vmem [resolvable:$true] %s946_s23 }
  0x2c   : > { %1101 = vmatmul.msk.bf16.vlgmr.msra.gmra.mxu0 %vm406_vm0, %v1681_v2  ;;  %s932_s27 = scalar_lea.sflag [#allocation7], %s359_s9 }
  0xa9   : > { %v419_v3 = vpop.f32.mrf.mxu0 }
  0xaa   : > { %v1102_v4 = vmul.f32 -1.442695, %v419_v3 }
  0xac   : > { %1313 = vpow2.f32 %v1102_v4 }
  0xb1   : > { %v421_v5 = vpop.f32.mrf.mxu0 }
  0xb2   : > { %v1314_v6 = vpop.eup %1313  ;;  %v1103_v7 = vmul.f32 -1.442695, %v421_v5 }
  0xb3   : > { %v430_v8 = vadd.f32 1.0, %v1314_v6 }
  0xb4   : > { %1315 = vpow2.f32 %v1103_v7 }
  0xb5   : > { %1317 = vrcp.f32 %v430_v8  ;;  %v443_v18 = vand.u32 2147483648, %v430_v8  ;;  %vm437_vm2 = vweird.f32 %v430_v8  ;;  %v441_v19 = vand.u32 2147483647, %v430_v8 }
  0xb7   : > { %v444_v25 = vor.u32 1.1754944e-38, %v443_v18  ;;  %vm442_vm5 = vcmp.eq.f32.partialorder %v441_v19, 8.507059e+37 }
  0xba   : > { %v1316_v9 = vpop.eup %1315 }
  0xbb   : > { %v1318_v10 = vpop.eup %1317  ;;  %v431_v11 = vadd.f32 1.0, %v1316_v9 }
  0xbc   : > { %v433_v12 = vmul.f32 %v1318_v10, %v430_v8  ;;  %vm438_vm1 = vweird.f32 %v1318_v10 }
  0xbd   : > { %1319 = vrcp.f32 %v431_v11  ;;  %vm439_vm3 = vmor %vm437_vm2, %vm438_vm1  ;;  %v458_v21 = vand.u32 2147483648, %v431_v11  ;;  %v456_v24 = vand.u32 2147483647, %v431_v11  ;;  %vm452_vm6 = vweird.f32 %v431_v11 }
  0xbe   : > { %v434_v13 = vsub.f32 1.0, %v433_v12  ;;  %v1191_v12 = vld [vmem:[#allocation8 + $0x8] sm:$0xff]  ;;  %vm540_vm2 = vcmask 519168  }
  0xbf   : > { %v459_v29 = vor.u32 1.1754944e-38, %v458_v21  ;;  %vm457_vm8 = vcmp.eq.f32.partialorder %v456_v24, 8.507059e+37  ;;  %486 = vmatpush.bf16.msra.mxu1 %v1191_v12  ;;  %v1206_v12 = vld [vmem:[%s1797_s5 + $0x18] sm:$0xff] }
  0xc0   : > { %v435_v14 = vmul.f32 %v1318_v10, %v434_v13  ;;  %v1190_v13 = vld [vmem:[#allocation8] sm:$0xff] }
  0xc2   : > { %v436_v16 = vadd.f32 %v1318_v10, %v435_v14 }
  0xc3   : > { %v1320_v15 = vpop.eup %1319  ;;  %487 = vmatpush.bf16.msra.mxu1 %v1190_v13 }
  0xc4   : > { %v448_v17 = vmul.f32 %v1320_v15, %v431_v11  ;;  %v440_v22 = vsel %vm439_vm3, %v1318_v10, %v436_v16  ;;  %vm453_vm4 = vweird.f32 %v1320_v15 }
  0xc5   : > { %v445_v28 = vsel %vm442_vm5, %v444_v25, %v440_v22  ;;  %vm454_vm7 = vmor %vm452_vm6, %vm453_vm4  ;;  %v1193_v25 = vld [vmem:[#allocation5 + $0x8] sm:$0xff] }
  0xc6   : > { %v449_v20 = vsub.f32 1.0, %v448_v17  ;;  %v462_v33 = vmul.f32 %v445_v28, %v419_v3  ;;  %1112 = vmatmul.msk.bf16.vlgmr.msra.gmra.mxu1 %vm406_vm0, %v1681_v2  ;;  %641 = vmatpush.bf16.msra.mxu2 %v1193_v25  ;;  %v1719_v28 = vld [vmem:[%s375_s30] sm:$0xff] }
  0xc7   : > { %876 = vmatpush.bf16.msrb.mxu1 %v1206_v12 }
  0xc8   : > { %v450_v23 = vmul.f32 %v1320_v15, %v449_v20 }
  0xca   : > { %v451_v27 = vadd.f32 %v1320_v15, %v450_v23 }
  0xcc   : > { %v455_v30 = vsel %vm454_vm7, %v1320_v15, %v451_v27  ;;  %v1192_v27 = vld [vmem:[#allocation5] sm:$0xff] }
  0xcd   : > { %v460_v32 = vsel %vm457_vm8, %v459_v29, %v455_v30  ;;  %v1721_v29 = vld [vmem:[%s375_s30 + $0x8] sm:$0xff]  ;;  %642 = vmatpush.bf16.msra.mxu2 %v1192_v27  ;;  %s948_s30 = sshll.u32 %s945_s20, 4  ;;  %s949_s30 = int_to_ptr.hbm [resolvable:$true] %s948_s30 }
  0xce   : > { %v463_v34 = vmul.f32 %v460_v32, %v421_v5  ;;  %v614_v30 = vpack.c.bf16 %v1721_v29, %v1719_v28  ;;  %s1455_s8 = sshra.s32 %s949_s30, 4  ;;  %s1456_s8 = int_to_ptr.hbm [resolvable:$true] %s1455_s8 }
  0xcf   : > { %s1457_s10 = scalar_lea.hbm %s1456_s8, 16  ;;  %p1462_p5 = scmp.lt.s32.totalorder %s1456_s8, %s1799_s7 }
  0xd0   : > { %v1211_v35 = vpack.c.bf16 %v463_v34, %v462_v33  ;;  %1123 = vmatmul.msk.bf16.vlgmr.msra.gmra.mxu2 %vm406_vm0, %v614_v30  ;;  %p1458_p1 = scmp.ne.s32.totalorder %s1456_s8, %s1457_s10  ;;  %p1463_p6 = scmp.lt.s32.totalorder %s1461_s18, %s1457_s10 }
  0xd2   : > { %v1215_v37 = vunpack.c.l.bf16 %v1211_v35  ;;  %v1216_v38 = vunpack.c.h.bf16 %v1211_v35  ;;  %p1459_p2 = pnand %p1458_p1, %p1617_p4  ;;  %p1464_p7 = por %p1463_p6, %p1462_p5 }
  0xd4   : > { %547 = vxpose.xlu0.b32.start [1/2] (short) %v1215_v37, 128  ;;  %v1688_v39 = vmul.f32 %v1215_v37, %v701_v36  ;;  %v1690_v40 = vmul.f32 %v1216_v38, %v701_v36  ;;  %p1460_p3 = pneg %p1459_p2 }
  0xd6   : > { %v705_v41 = vpack.c.bf16 %v1690_v40, %v1688_v39  ;;  %p1465_p9 = pnand %p1464_p7, %p1460_p3 }
  0xdc   : > { %548 = vxpose.xlu0.b32.end [2/2] (short) %v1216_v38, 128 }
 0x143   : > { %v489_v21 = vpop.f32.mrf.mxu1 }
 0x144   : > { %v1113_v22 = vmul.f32 -1.442695, %v489_v21 }
 0x146   : > { %1321 = vpow2.f32 %v1113_v22 }
 0x14b   : > { %v491_v23 = vpop.f32.mrf.mxu1 }
 0x14c   : > { %v1322_v2 = vpop.eup %1321  ;;  %v1114_v24 = vmul.f32 -1.442695, %v491_v23 }
 0x14d   : > { %v500_v26 = vadd.f32 1.0, %v1322_v2 }
 0x14e   : > { %1323 = vpow2.f32 %v1114_v24 }
 0x14f   : > { %1325 = vrcp.f32 %v500_v26  ;;  %v513_v35 = vand.u32 2147483648, %v500_v26  ;;  %vm507_vm11 = vweird.f32 %v500_v26  ;;  %v511_v37 = vand.u32 2147483647, %v500_v26 }
 0x151   : > { %vm512_vm14 = vcmp.eq.f32.partialorder %v511_v37, 8.507059e+37 }
 0x154   : > { %v1324_v31 = vpop.eup %1323 }
 0x155   : > { %v1326_v32 = vpop.eup %1325  ;;  %v501_v33 = vadd.f32 1.0, %v1324_v31 }
 0x156   : > { %v503_v34 = vmul.f32 %v1326_v32, %v500_v26  ;;  %vm508_vm12 = vweird.f32 %v1326_v32 }
 0x157   : > { %1327 = vrcp.f32 %v501_v33  ;;  %vm509_vm13 = vmor %vm507_vm11, %vm508_vm12  ;;  %vm522_vm15 = vweird.f32 %v501_v33 }
 0x158   : > { %v504_v36 = vsub.f32 1.0, %v503_v34 }
 0x15a   : > { %v505_v40 = vmul.f32 %v1326_v32, %v504_v36 }
 0x178   : > { %v563_v42 = vpop.trf.xlu0 }
 0x179   : > { %v579_v43 = vpack.c.bf16 %v563_v42, %v563_v42  ;;  %v506_v42 = vadd.f32 %v1326_v32, %v505_v40 }
 0x17b   : > { %596 = vst.msk [vmem:[#allocation3] sm:$0xf] %vm595_vm9, %v579_v43  ;;  %v1328_v43 = vpop.eup %1327 }
 0x17c   : > { %vm523_vm1 = vweird.f32 %v1328_v43 }
 0x17d   : > { %vm524_vm3 = vmor %vm522_vm15, %vm523_vm1 }
 0x180   : > { %v564_v44 = vpop.trf.xlu0 }
 0x181   : > { %v580_v45 = vpack.c.bf16 %v564_v44, %v564_v44  ;;  %v510_v44 = vsel %vm509_vm13, %v1326_v32, %v506_v42  ;;  %vm868_vm13 = vcmask 523264  }
 0x183   : > { %597 = vst.msk [vmem:[#allocation3 + $0x4] sm:$0xf] %vm595_vm9, %v580_v45  ;;  %v518_v45 = vmul.f32 %v1328_v43, %v501_v33 }
 0x188   : > { %v565_v46 = vpop.trf.xlu0 }
 0x189   : > { %v581_v47 = vpack.c.bf16 %v565_v46, %v565_v46 }
 0x18a   : > { %v1194_v20 = vld [vmem:[#allocation3] sm:$0xff] }
 0x18b   : > { %598 = vst.msk [vmem:[#allocation3 + $0x8] sm:$0xf] %vm595_vm9, %v581_v47  ;;  %v528_v47 = vand.u32 2147483648, %v501_v33 }
 0x190   : > { %v566_v48 = vpop.trf.xlu0 }
 0x191   : > { %v582_v49 = vpack.c.bf16 %v566_v48, %v566_v48 }
 0x193   : > { %599 = vst.msk [vmem:[#allocation3 + $0xc] sm:$0xf] %vm595_vm9, %v582_v49  ;;  %v519_v49 = vsub.f32 1.0, %v518_v45 }
 0x198   : > { %v567_v50 = vpop.trf.xlu0 }
 0x199   : > { %v583_v51 = vpack.c.bf16 %v567_v50, %v567_v50  ;;  %v526_v50 = vand.u32 2147483647, %v501_v33 }
 0x19a   : > { %v1195_v19 = vld [vmem:[#allocation3 + $0x8] sm:$0xff] }
 0x19b   : > { %600 = vst.msk [vmem:[#allocation3 + $0x10] sm:$0xf] %vm595_vm9, %v583_v51  ;;  %vm527_vm4 = vcmp.eq.f32.partialorder %v526_v50, 8.507059e+37 }
 0x1a0   : > { %v568_v52 = vpop.trf.xlu0 }
 0x1a1   : > { %v584_v53 = vpack.c.bf16 %v568_v52, %v568_v52 }
 0x1a3   : > { %601 = vst.msk [vmem:[#allocation3 + $0x14] sm:$0xf] %vm595_vm9, %v584_v53 }
 0x1a8   : > { %v569_v54 = vpop.trf.xlu0 }
 0x1a9   : > { %v585_v55 = vpack.c.bf16 %v569_v54, %v569_v54  ;;  %v520_v54 = vmul.f32 %v1328_v43, %v519_v49 }
 0x1aa   : > { %v1196_v18 = vld [vmem:[#allocation3 + $0x10] sm:$0xff] }
 0x1ab   : > { %602 = vst.msk [vmem:[#allocation3 + $0x18] sm:$0xf] %vm595_vm9, %v585_v55  ;;  %v529_v55 = vor.u32 1.1754944e-38, %v528_v47 }
 0x1b0   : > { %v570_v56 = vpop.trf.xlu0 }
 0x1b1   : > { %v586_v57 = vpack.c.bf16 %v570_v56, %v570_v56  ;;  %v521_v56 = vadd.f32 %v1328_v43, %v520_v54 }
 0x1b3   : > { %603 = vst.msk [vmem:[#allocation3 + $0x1c] sm:$0xf] %vm595_vm9, %v586_v57  ;;  %v525_v57 = vsel %vm524_vm3, %v1328_v43, %v521_v56 }
 0x1b8   : > { %v571_v58 = vpop.trf.xlu0 }
 0x1b9   : > { %v587_v59 = vpack.c.bf16 %v571_v58, %v571_v58  ;;  %v530_v58 = vsel %vm527_vm4, %v529_v55, %v525_v57 }
 0x1ba   : > { %v1197_v17 = vld [vmem:[#allocation3 + $0x18] sm:$0xff] }
 0x1bb   : > { %604 = vst.msk [vmem:[#allocation3 + $0x20] sm:$0xf] %vm595_vm9, %v587_v59  ;;  %v533_v59 = vmul.f32 %v530_v58, %v491_v23 }
 0x1c0   : > { %v572_v60 = vpop.trf.xlu0 }
 0x1c1   : > { %v588_v61 = vpack.c.bf16 %v572_v60, %v572_v60  ;;  %v537_v60 = vpack.c.bf16 %v533_v59, %v533_v59 }
 0x1c3   : > { %605 = vst.msk [vmem:[#allocation3 + $0x24] sm:$0xf] %vm595_vm9, %v588_v61 }
 0x1c4   : > { %542 = vst.msk [vmem:[#allocation4 + $0x4] sm:$0xf] %vm540_vm2, %v537_v60 }
 0x1c8   : > { %v573_v62 = vpop.trf.xlu0 }
 0x1c9   : > { %v589_v63 = vpack.c.bf16 %v573_v62, %v573_v62 }
 0x1ca   : > { %v1198_v16 = vld [vmem:[#allocation3 + $0x20] sm:$0xff] }
 0x1cb   : > { %606 = vst.msk [vmem:[#allocation3 + $0x28] sm:$0xf] %vm595_vm9, %v589_v63 }
 0x1d0   : > { %v574_v0 = vpop.trf.xlu0 }
 0x1d1   : > { %v590_v1 = vpack.c.bf16 %v574_v0, %v574_v0 }
 0x1d3   : > { %607 = vst.msk [vmem:[#allocation3 + $0x2c] sm:$0xf] %vm595_vm9, %v590_v1 }
 0x1d8   : > { %v575_v3 = vpop.trf.xlu0 }
 0x1d9   : > { %v591_v4 = vpack.c.bf16 %v575_v3, %v575_v3 }
 0x1da   : > { %v1199_v15 = vld [vmem:[#allocation3 + $0x28] sm:$0xff] }
 0x1db   : > { %608 = vst.msk [vmem:[#allocation3 + $0x30] sm:$0xf] %vm595_vm9, %v591_v4 }
 0x1e0   : > { %v576_v5 = vpop.trf.xlu0 }
 0x1e1   : > { %v592_v6 = vpack.c.bf16 %v576_v5, %v576_v5 }
 0x1e3   : > { %609 = vst.msk [vmem:[#allocation3 + $0x34] sm:$0xf] %vm595_vm9, %v592_v6 }
 0x1e8   : > { %v577_v7 = vpop.trf.xlu0 }
 0x1e9   : > { %v593_v8 = vpack.c.bf16 %v577_v7, %v577_v7 }
 0x1ea   : > { %v1200_v14 = vld [vmem:[#allocation3 + $0x30] sm:$0xff] }
 0x1eb   : > { %610 = vst.msk [vmem:[#allocation3 + $0x38] sm:$0xf] %vm595_vm9, %v593_v8 }
 0x1f0   : > { %v578_v9 = vpop.trf.xlu0 }
 0x1f1   : > { %v594_v10 = vpack.c.bf16 %v578_v9, %v578_v9 }
 0x1f3   : > { %611 = vst.msk [vmem:[#allocation3 + $0x3c] sm:$0xf] %vm595_vm9, %v594_v10  ;;  %v644_v10 = vpop.f32.mrf.mxu2 }
 0x1f4   : > { %v1124_v13 = vmul.f32 -1.442695, %v644_v10 }
 0x1fa   : > { %v1201_v11 = vld [vmem:[#allocation3 + $0x38] sm:$0xff] }
 0x1fb   : > { %770 = vmatpush.bf16.msra.mxu3 %v1201_v11  ;;  %v646_v11 = vpop.f32.mrf.mxu2 }
 0x1ff   : > { %771 = vmatpush.bf16.msra.mxu3 %v1200_v14  ;;  %v1125_v14 = vmul.f32 -1.442695, %v646_v11 }
 0x203   : > { %772 = vmatpush.bf16.msra.mxu3 %v1199_v15 }
 0x207   : > { %773 = vmatpush.bf16.msra.mxu3 %v1198_v16  ;;  %v1205_v16 = vld [vmem:[%s1797_s5 + $0x10] sm:$0xff] }
 0x208   : > { %877 = vmatpush.bf16.msrb.mxu1 %v1205_v16 }
 0x20b   : > { %774 = vmatpush.bf16.msra.mxu3 %v1197_v17 }
 0x20f   : > { %775 = vmatpush.bf16.msra.mxu3 %v1196_v18  ;;  %v1204_v18 = vld [vmem:[%s1797_s5 + $0x8] sm:$0xff] }
 0x210   : > { %878 = vmatpush.bf16.msrb.mxu1 %v1204_v18 }
 0x213   : > { %776 = vmatpush.bf16.msra.mxu3 %v1195_v19 }
 0x217   : > { %777 = vmatpush.bf16.msra.mxu3 %v1194_v20 }
 0x21a   : > { %778 = vmatmul.bf16.vlgmr.msra.gmra.mxu3 %v705_v41  ;;  %v514_v41 = vor.u32 1.1754944e-38, %v513_v35 }
 0x21c   : > { %v515_v46 = vsel %vm512_vm14, %v514_v41, %v510_v44 }
 0x21d   : > { %v532_v48 = vmul.f32 %v515_v46, %v489_v21  ;;  %v1203_v21 = vld [vmem:[%s1797_s5] sm:$0xff] }
 0x21e   : > { %879 = vmatpush.bf16.msrb.mxu1 %v1203_v21 }
 0x21f   : > { %v536_v53 = vpack.c.bf16 %v532_v48, %v532_v48 }
 0x221   : > { %541 = vst.msk [vmem:[#allocation4] sm:$0xf] %vm540_vm2, %v536_v53 }
 0x228   : > { %v1202_v61 = vld [vmem:[#allocation4] sm:$0xff] }
 0x229   : > { %822 = vmatpush.bf16.msrb.mxu0 %v1202_v61 }
 0x29d   : > { %v779_v38 = vpop.f32.mrf.mxu3 }
 0x29e   : > { %v785_v39 = vsel %vm784_vm10, %v779_v38, -inf }
 0x29f   : > { %786 = vmax.xlane.f32.xlu1 %v785_v39 }
 0x2a5   : > { %v781_v51 = vpop.f32.mrf.mxu3 }
 0x2a6   : > { %v788_v52 = vsel %vm784_vm10, %v781_v51, -inf }
 0x2a7   : > { %789 = vmax.xlane.f32.xlu1 %v788_v52 }
 0x312   : > { %v787_v62 = vpop.xlane.xlu1 %786 }
 0x313   : > { %v791_v63 = vsub.f32 %v779_v38, %v787_v62 }
 0x315   : > { %v793_v0 = vmul.f32 1.442695, %v791_v63 }
 0x317   : > { %1329 = vpow2.f32 %v793_v0 }
 0x31a   : > { %v790_v1 = vpop.xlane.xlu1 %789 }
 0x31b   : > { %v792_v3 = vsub.f32 %v781_v51, %v790_v1  ;;  %v1534_v1 = vmov 32.0  }
 0x31d   : > { %v1330_v4 = vpop.eup %1329  ;;  %v795_v5 = vmul.f32 1.442695, %v792_v3 }
 0x31e   : > { %v797_v6 = vsel %vm784_vm10, %v1330_v4, 0.0 }
 0x31f   : > { %1331 = vpow2.f32 %v795_v5  ;;  %798 = vadd.xlane.f32.xlu2 %v797_v6 }
 0x320   : > { %1333 = vpow2.f32 %v1124_v13 }
 0x321   : > { %1335 = vpow2.f32 %v1125_v14 }
 0x325   : > { %v1332_v7 = vpop.eup %1331 }
 0x326   : > { %v800_v8 = vsel %vm784_vm10, %v1332_v7, 0.0  ;;  %v803_v9 = vpack.c.bf16 %v1332_v7, %v1330_v4  ;;  %v1334_v15 = vpop.eup %1333 }
 0x327   : > { %801 = vadd.xlane.f32.xlu2 %v800_v8  ;;  %v1336_v17 = vpop.eup %1335  ;;  %v655_v19 = vadd.f32 1.0, %v1334_v15 }
 0x328   : > { %1162 = vmatmul.msk.bf16.vlgmr.msrb.gmra.mxu0 %vm784_vm10, %v803_v9  ;;  %v656_v20 = vadd.f32 1.0, %v1336_v17 }
 0x329   : > { %1337 = vrcp.f32 %v655_v19  ;;  %vm662_vm5 = vweird.f32 %v655_v19  ;;  %v668_v32 = vand.u32 2147483648, %v655_v19  ;;  %v666_v36 = vand.u32 2147483647, %v655_v19 }
 0x32a   : > { %1339 = vrcp.f32 %v656_v20  ;;  %vm677_vm7 = vweird.f32 %v656_v20  ;;  %v683_v33 = vand.u32 2147483648, %v656_v20  ;;  %v681_v38 = vand.u32 2147483647, %v656_v20 }
 0x32b   : > { %v669_v41 = vor.u32 1.1754944e-38, %v668_v32  ;;  %vm667_vm11 = vcmp.eq.f32.partialorder %v666_v36, 8.507059e+37 }
 0x32c   : > { %v684_v42 = vor.u32 1.1754944e-38, %v683_v33  ;;  %vm682_vm12 = vcmp.eq.f32.partialorder %v681_v38, 8.507059e+37 }
 0x32f   : > { %v1338_v22 = vpop.eup %1337 }
 0x330   : > { %v1340_v23 = vpop.eup %1339  ;;  %v658_v2 = vmul.f32 %v1338_v22, %v655_v19  ;;  %vm663_vm6 = vweird.f32 %v1338_v22 }
 0x331   : > { %v673_v24 = vmul.f32 %v1340_v23, %v656_v20  ;;  %vm678_vm8 = vweird.f32 %v1340_v23  ;;  %vm1743_vm9 = vmor %vm662_vm5, %vm663_vm6 }
 0x332   : > { %v659_v26 = vsub.f32 1.0, %v658_v2  ;;  %vm679_vm10 = vmor %vm677_vm7, %vm678_vm8 }
 0x333   : > { %v674_v27 = vsub.f32 1.0, %v673_v24 }
 0x334   : > { %v660_v30 = vmul.f32 %v1338_v22, %v659_v26 }
 0x335   : > { %v675_v31 = vmul.f32 %v1340_v23, %v674_v27 }
 0x336   : > { %v661_v34 = vadd.f32 %v1338_v22, %v660_v30 }
 0x337   : > { %v676_v37 = vadd.f32 %v1340_v23, %v675_v31 }
 0x338   : > { %v665_v43 = vsel %vm1743_vm9, %v1338_v22, %v661_v34 }
 0x339   : > { %v680_v44 = vsel %vm679_vm10, %v1340_v23, %v676_v37  ;;  %v670_v46 = vsel %vm667_vm11, %v669_v41, %v665_v43 }
 0x33a   : > { %v685_v47 = vsel %vm682_vm12, %v684_v42, %v680_v44  ;;  %v687_v51 = vmul.f32 %v670_v46, %v644_v10 }
 0x33b   : > { %v688_v52 = vmul.f32 %v685_v47, %v646_v11 }
 0x392   : > { %v799_v25 = vpop.xlane.xlu2 %798 }
 0x393   : > { %1341 = vrcp.f32 %v799_v25 }
 0x399   : > { %v1342_v45 = vpop.eup %1341 }
 0x39a   : > { %v802_v39 = vpop.xlane.xlu2 %801 }
 0x39b   : > { %1343 = vrcp.f32 %v802_v39 }
 0x39c   : > { %1345 = vrcp.f32 %v1534_v1 }
 0x3a1   : > { %v1344_v49 = vpop.eup %1343 }
 0x3a2   : > { %v1346_v3 = vpop.eup %1345 }
 0x3a3   : > { %v897_v4 = vmul.f32 32.0, %v1346_v3  ;;  %vm901_vm14 = vweird.f32 %v1346_v3 }
 0x3a5   : > { %v824_v40 = vpop.f32.mrf.mxu0  ;;  %v898_v5 = vsub.f32 1.0, %v897_v4 }
 0x3a6   : > { %v831_v48 = vmul.f32 %v1342_v45, %v824_v40 }
 0x3a7   : > { %v899_v6 = vmul.f32 %v1346_v3, %v898_v5 }
 0x3a8   : > { %v833_v54 = vmul.f32 %v831_v48, %v687_v51 }
 0x3a9   : > { %v900_v7 = vadd.f32 %v1346_v3, %v899_v6 }
 0x3ad   : > { %v826_v50 = vpop.f32.mrf.mxu0 }
 0x3ae   : > { %v832_v53 = vmul.f32 %v1344_v49, %v826_v50 }
 0x3b0   : > { %v834_v55 = vmul.f32 %v832_v53, %v688_v52 }
 0x3b2   : > { %v835_v56 = vpack.c.bf16 %v834_v55, %v833_v54 }
 0x3b4   : > { %1179 = vmatmul.msk.bf16.vlgmr.msrb.gmra.mxu1 %vm868_vm13, %v835_v56 }
 0x431   : > { %v881_v57 = vpop.f32.mrf.mxu1 }
 0x432   : > { %v886_v58 = vadd.f32 %v881_v57, %v1719_v28  ;;  %v902_v28 = vsel %vm901_vm14, %v1346_v3, %v900_v7 }
 0x434   : > { %v888_v59 = vmul.f32 %v886_v58, %v886_v58 }
 0x436   : > { %v890_v60 = vsel %vm406_vm0, %v888_v59, 0.0 }
 0x437   : > { %891 = vadd.xlane.f32.xlu0 %v890_v60 }
 0x439   : > { %v883_v61 = vpop.f32.mrf.mxu1 }
 0x43a   : > { %v887_v62 = vadd.f32 %v883_v61, %v1721_v29 }
 0x43c   : > { %v889_v63 = vmul.f32 %v887_v62, %v887_v62 }
 0x43e   : > { %v893_v0 = vsel %vm406_vm0, %v889_v63, 0.0 }
 0x43f   : > { %894 = vadd.xlane.f32.xlu1 %v893_v0 }
 0x4aa   : > { %v892_v8 = vpop.xlane.xlu0 %891 }
 0x4ab   : > { %v903_v9 = vmul.f32 %v902_v28, %v892_v8 }
 0x4ad   : > { %v905_v10 = vadd.f32 1e-12, %v903_v9 }
 0x4af   : > { %1347 = vrsqrt.f32 %v905_v10  ;;  %vm913_vm1 = vweird.f32 %v905_v10 }
 0x4b2   : > { %v895_v11 = vpop.xlane.xlu1 %894 }
 0x4b3   : > { %v904_v29 = vmul.f32 %v902_v28, %v895_v11 }
 0x4b5   : > { %v1348_v12 = vpop.eup %1347  ;;  %v906_v13 = vadd.f32 1e-12, %v904_v29 }
 0x4b6   : > { %v908_v14 = vmul.f32 %v1348_v12, %v905_v10  ;;  %vm914_vm15 = vweird.f32 %v1348_v12 }
 0x4b7   : > { %1349 = vrsqrt.f32 %v906_v13  ;;  %vm915_vm2 = vmor %vm913_vm1, %vm914_vm15  ;;  %vm923_vm4 = vweird.f32 %v906_v13 }
 0x4b8   : > { %v909_v15 = vmul.f32 %v1348_v12, %v908_v14 }
 0x4ba   : > { %v910_v16 = vmul.f32 0.5, %v909_v15 }
 0x4bc   : > { %v911_v17 = vsub.f32 1.5, %v910_v16 }
 0x4bd   : > { %v1350_v18 = vpop.eup %1349 }
 0x4be   : > { %v912_v19 = vmul.f32 %v1348_v12, %v911_v17  ;;  %v918_v20 = vmul.f32 %v1350_v18, %v906_v13  ;;  %vm924_vm3 = vweird.f32 %v1350_v18 }
 0x4bf   : > { %vm925_vm5 = vmor %vm923_vm4, %vm924_vm3 }
 0x4c0   : > { %v916_v21 = vsel %vm915_vm2, %v1348_v12, %v912_v19  ;;  %v919_v22 = vmul.f32 %v1350_v18, %v918_v20 }
 0x4c1   : > { %v927_v23 = vmul.f32 %v916_v21, %v886_v58 }
 0x4c2   : > { %v920_v2 = vmul.f32 0.5, %v919_v22 }
 0x4c3   : > { %929 = vst.msk [vmem:[%s361_s22] sm:$0xff] %vm406_vm0, %v927_v23 }
 0x4c4   : > { %v921_v24 = vsub.f32 1.5, %v920_v2 }
 0x4c6   : > { %v922_v25 = vmul.f32 %v1350_v18, %v921_v24 }
 0x4c8   : > { %v926_v26 = vsel %vm925_vm5, %v1350_v18, %v922_v25 }
 0x4c9   : > { %v928_v27 = vmul.f32 %v926_v26, %v887_v62 }
 0x4cb   : > { %930 = vst.msk [vmem:[%s361_s22 + $0x8] sm:$0xff] %vm406_vm0, %v928_v27 }
 0x4cc   : > { %1468 = shalt.err (!%p1465_p9)
}
 0x4cd   : > { %s1535_s28 = smov 128   ;;  %s1536_s9 = smov 8  }
 0x4ce   : > { %1233 = dma.vmem_to_hbm [thread:$0]  (%p1617_p4), %s947_s23, 256, %s949_s30, %s932_s27, %s1535_s28, %s1535_s28, %s1536_s9  }
 0x4cf PF: > { %p1255_p10 = scmp.ge.s32.totalorder %s1527_s29, 2  ;;  %s963_s14 = sand.u32 1, %s1507_s24  }
 0x4d0   : > { %s964_s15 = scalar_lea.sflag [#allocation7], %s963_s14 }
 0x4d1   : > { %p1246_p11 = pnand %p1255_p10, %p1624_p8 }
 0x4d3   : > { %p1247_p12 = pneg %p1246_p11 }
 0x4d5   : > { %1502 = dma.done.wait (%p1247_p12), %s964_s15, 256  }
 0x4d6   : > { %1504 = vsyncadd (%p1247_p12), %s964_s15, 4294967040  ;;  %s22_s29 = sadd.s32 1, %s1527_s29   ;;  %s1814_s16 = sld [smem:[#allocation17_spill]] }
 0x4d7   : > { %p19_p13 = scmp.ge.s32.totalorder %s22_s29, 4   ;;  %s1815_s27 = sld [smem:[#allocation15_spill]] }
 0x4d8   : > { %s1816_s28 = sld [smem:[#allocation16_spill]]  ;;  %s1817_s24 = smov %s1511_s25 }
 0x4d9   : > { %s1818_s25 = smov %s1515_s26  ;;  %21 = sbr.rel (!%p19_p13) target bundleno = 8 (0x8), region = 104 }
 0x4dc   : > { %s1819_s26 = smov %s1814_s16 }
 0x4de   :  { %970 = vsyncpa [#allocation6], 1 }
 0x4df   :  { %972 = vsyncpa [#allocation6 + $0x1], 1 }
 0x4e0   :  { %973 = vsyncpa [#allocation9], 1 }
 0x4e1   :  { %974 = vsyncpa [#allocation7], 1 }
 0x4e2   :  { %976 = vsyncpa [#allocation7 + $0x1], 1 }

</bundles_post_ra>
